<compile_context>
chip_gen: v6e
topology: v6e:2x2x1
jax: 0.10.0
libtpu: 0.0.40
codegen_flags: <defaults>
</compile_context>

<pallas_src>
import functools

import jax
import jax.numpy as jnp
from jax.experimental import pallas as pl
from jax.experimental.pallas import tpu as pltpu

LANE = 128          # TPU lane width
ALIGN = 128         # lane offset of the activation window inside pad_ref


def _round_up(x, m):
    return (x + m - 1) // m * m


def _residual_group_kernel(x_ref, mask_ref, w1_ref, b1_ref, w2_ref, b2_ref,
                           cw1_ref, cb1_ref, cw2_ref, cb2_ref,
                           wt_ref, bt_ref, o_ref, pad_ref,
                           *, H, W, NB, BI, S):
    """One grid step == BI images batched along lanes.

    x_ref   : (C, EW) f32   input slab (gap lanes are zero), EW = BI * S
    mask_ref: (1, EW) f32   1.0 on real pixels, 0.0 on gap lanes
    w1/w2   : (NB, 3C, 3C)  bf16 conv weights, rows grouped by kernel column kx,
                            cols grouped by kernel row ky (matches the patch)
    b1/b2   : (NB, C, 1)    f32
    cw1/cb1 : (NB, C, Cr) / (NB, 1, Cr)   CA squeeze (contract over C)
    cw2/cb2 : (NB, C, Cr) / (NB, C, 1)    CA excite  (contract over Cr)
    wt/bt   : (3C, 3C) bf16 / (C, 1) f32  tail conv of the group
    o_ref   : (C, EW) f32   output slab (gap lanes written as zero)
    pad_ref : (C, PW) bf16  flat zero-padded activation scratch; the activation
                            window lives at lanes [ALIGN, ALIGN + EW)
    """
    C = x_ref.shape[0]
    W2 = W + 2
    E = H * W2                      # per-image flattened padded-row extent
    EW = BI * S                     # working lane width (multiple of 128)
    inv_hw = 1.0 / (H * W)

    valid = mask_ref[...]           # (1, EW)

    def write_act(v_f32):
        # start (ALIGN) and width (EW) are multiples of 128 -> unmasked vst
        pad_ref[:, pl.ds(ALIGN, EW)] = v_f32.astype(pad_ref.dtype)

    def shift_r1(v):                # out[:, q] = v[:, q-1]   (wrap col is a gap)
        return jnp.concatenate([v[:, EW - 1:], v[:, :EW - 1]], axis=1)

    def shift_l1(v):                # out[:, q] = v[:, q+1]
        return jnp.concatenate([v[:, 1:], v[:, :1]], axis=1)

    def conv3x3(wmat, bias):
        # SAME 3x3 conv as a single fused matmul:
        #   three row-slab loads (dy = -1, 0, +1; dy=0 is lane-aligned) build a
        #   (3C, EW) patch; row block kx of (3C,3C)@(3C,EW) holds the
        #   contribution of kernel column kx, recovered with +/-1 lane shifts.
        # All zero-padding at row/column borders falls out of the zero gaps.
        patch = jnp.concatenate(
            [pad_ref[:, pl.ds(ALIGN + (dy - 1) * W2, EW)] for dy in range(3)],
            axis=0)                                                # (3C, EW) bf16
        res = jnp.dot(wmat, patch,
                      preferred_element_type=jnp.float32)          # (3C, EW) f32
        out = (res[C:2 * C]                 # kx = 1 (centre column)
               + shift_r1(res[:C])          # kx = 0: out[q] += res[q-1]
               + shift_l1(res[2 * C:]))     # kx = 2: out[q] += res[q+1]
        return out + bias                                           # (C, EW) f32

    def ca_gate(h2m, cw1, cb1, cw2, cb2):
        # CALayer on the VPU/XLU, per image.  Images are disjoint lane segments
        # of length S (a multiple of 128), so every slice below is aligned.
        segs = []
        for b in range(BI):
            seg = h2m[:, b * S:(b + 1) * S]                        # (C, S)
            pooled = jnp.sum(seg, axis=1, keepdims=True) * inv_hw  # (C, 1)
            t = jnp.maximum(
                jnp.sum(cw1 * pooled, axis=0, keepdims=True) + cb1, 0.0)  # (1,Cr)
            gate = jax.nn.sigmoid(
                jnp.sum(cw2 * t, axis=1, keepdims=True) + cb2)     # (C, 1)
            segs.append(seg * gate)
        return segs[0] if BI == 1 else jnp.concatenate(segs, axis=1)

    # ---- load the group input into the zeroed padded scratch slab ----
    pad_ref[...] = jnp.zeros_like(pad_ref)
    x0 = x_ref[...] * valid                                        # (C, EW) f32
    write_act(x0)

    cur = x0
    # NOTE: static unroll is fine at small NB; for production depth (20) switch
    # to lax.fori_loop with pl.ds-indexed weight slices to bound live ranges.
    for r in range(NB):
        # RCAB: conv3x3 -> ReLU -> conv3x3 -> channel attention -> + residual
        h1 = jnp.maximum(conv3x3(w1_ref[r], b1_ref[r]), 0.0)
        write_act(h1 * valid)
        h2m = conv3x3(w2_ref[r], b2_ref[r]) * valid                # gaps -> 0
        cur = cur + ca_gate(h2m, cw1_ref[r], cb1_ref[r],
                            cw2_ref[r], cb2_ref[r])
        write_act(cur)

    # ---- tail conv of the group + group-level residual (gaps zeroed) ----
    o_ref[...] = ((conv3x3(wt_ref[...], bt_ref[...]) + x0)
                  * valid).astype(o_ref.dtype)


def residual_group(x_nchw, params, *, images_per_block=None,
                   mxu_dtype=jnp.bfloat16):
    """x_nchw: (N, C, H, W) float32 (PyTorch layout). Returns (N, C, H, W)."""
    N, C, H, W = x_nchw.shape
    NB = params['w1'].shape[0]
    W2 = W + 2
    E = H * W2
    assert W2 <= ALIGN, "padded row stride must fit inside the aligned lead-in"

    # Images per grid step (lane batching).  Default: two grid steps so both
    # v7x TensorCores get work; pass images_per_block=N on single-TC v5e/v6e.
    if images_per_block is None:
        images_per_block = N // 2 if (N >= 2 and N % 2 == 0) else 1
    BI = images_per_block if (images_per_block >= 1 and N % images_per_block == 0) else 1
    NBLK = N // BI

    S = _round_up(E + W2 + 1, LANE)    # per-image lane stride (keeps the 3x3
                                       # taps of neighbouring images disjoint)
    EW = BI * S
    PW = _round_up(ALIGN + EW + W2, LANE)   # pad_ref lane width

    # ------------- wrapper-side layout plumbing (cheap at this size) --------
    # (At production SR resolutions fuse this pad/reshape and the final slice
    #  into the kernel with per-row DMAs to avoid extra HBM passes.)
    x_row = jnp.pad(x_nchw, ((0, 0), (0, 0), (0, 0), (0, 2))).reshape(N, C, E)
    x_slab = jnp.pad(x_row, ((0, 0), (0, 0), (0, S - E)))          # (N, C, S)
    x_blk = (x_slab.reshape(NBLK, BI, C, S)
             .transpose(0, 2, 1, 3).reshape(NBLK, C, EW))

    u = jnp.arange(EW)
    v = u % S
    maskp = ((v < E) & ((v % W2) < W)).astype(jnp.float32).reshape(1, EW)

    def conv_mat(w):
        # HWIO -> (3*Cout, 3*Cin): rows grouped by kernel column kx, columns
        # grouped by kernel row ky (matches the in-kernel patch ordering).
        if w.ndim == 4:                     # (3, 3, Cin, Cout)
            return (jnp.transpose(w, (1, 3, 0, 2))
                    .reshape(3 * C, 3 * C).astype(mxu_dtype))
        return (jnp.transpose(w, (0, 2, 4, 1, 3))
                .reshape(NB, 3 * C, 3 * C).astype(mxu_dtype))

    w1p = conv_mat(params['w1'])
    w2p = conv_mat(params['w2'])
    wtp = conv_mat(params['wt'])
    b1p = params['b1'][:, :, None].astype(jnp.float32)             # (NB, C, 1)
    b2p = params['b2'][:, :, None].astype(jnp.float32)             # (NB, C, 1)
    btp = params['bt'].reshape(C, 1).astype(jnp.float32)           # (C, 1)
    cw1p = params['cw1'].astype(jnp.float32)                       # (NB, C, Cr)
    cb1p = params['cb1'][:, None, :].astype(jnp.float32)           # (NB, 1, Cr)
    cw2p = jnp.transpose(params['cw2'], (0, 2, 1)).astype(jnp.float32)  # (NB,C,Cr)
    cb2p = params['cb2'][:, :, None].astype(jnp.float32)           # (NB, C, 1)

    def full_spec(a):
        return pl.BlockSpec(a.shape, lambda g, _nd=a.ndim: (0,) * _nd)

    kernel = functools.partial(_residual_group_kernel,
                               H=H, W=W, NB=NB, BI=BI, S=S)

    out_blk = pl.pallas_call(
        kernel,
        out_shape=jax.ShapeDtypeStruct((NBLK, C, EW), x_nchw.dtype),
        grid_spec=pltpu.PrefetchScalarGridSpec(
            num_scalar_prefetch=0,
            grid=(NBLK,),
            in_specs=[
                pl.BlockSpec((None, C, EW), lambda g: (g, 0, 0)),
                full_spec(maskp),
                full_spec(w1p), full_spec(b1p),
                full_spec(w2p), full_spec(b2p),
                full_spec(cw1p), full_spec(cb1p),
                full_spec(cw2p), full_spec(cb2p),
                full_spec(wtp), full_spec(btp),
            ],
            out_specs=pl.BlockSpec((None, C, EW), lambda g: (g, 0, 0)),
            scratch_shapes=[pltpu.VMEM((C, PW), mxu_dtype)],
        ),
        compiler_params=pltpu.CompilerParams(
            dimension_semantics=("parallel",)),
    )(x_blk, maskp, w1p, b1p, w2p, b2p, cw1p, cb1p, cw2p, cb2p, wtp, btp)

    # un-batch the lane segments, drop the per-image tail and the gap columns
    out = (out_blk.reshape(NBLK, C, BI, S).transpose(0, 2, 1, 3)
           .reshape(N, C, S)[:, :, :E]
           .reshape(N, C, H, W2)[:, :, :, :W])
    return out


# ----------------------------- pure-JAX reference -----------------------------
def _conv3x3_ref(x, w, b):
    y = jax.lax.conv_general_dilated(
        x, w, window_strides=(1, 1), padding='SAME',
        dimension_numbers=('NHWC', 'HWIO', 'NHWC'))
    return y + b


def residual_group_ref(x_nhwc, p):
    NB = p['w1'].shape[0]
    cur = x_nhwc
    for r in range(NB):
        h = jax.nn.relu(_conv3x3_ref(cur, p['w1'][r], p['b1'][r]))
        h2 = _conv3x3_ref(h, p['w2'][r], p['b2'][r])
        pooled = jnp.mean(h2, axis=(1, 2), keepdims=True)
        t = jax.nn.relu(jnp.einsum('nhwc,cd->nhwd', pooled, p['cw1'][r]) + p['cb1'][r])
        gate = jax.nn.sigmoid(jnp.einsum('nhwd,dc->nhwc', t, p['cw2'][r]) + p['cb2'][r])
        cur = cur + h2 * gate
    tail = _conv3x3_ref(cur, p['wt'], p['bt'][0])
    return tail + x_nhwc


# ----------------------------------- main ------------------------------------
if __name__ == "__main__":
    # Small ResidualGroup config: n_feat=16, kernel_size=3, reduction=4,
    # n_resblocks=2; input batch=2, spatial 16x16, NCHW like PyTorch.
    N, C, H, W = 2, 16, 16, 16
    RED, NB = 4, 2
    Cr = C // RED

    key = jax.random.PRNGKey(0)
    ks = jax.random.split(key, 12)
    s = 0.1
    params = {
        'w1':  jax.random.normal(ks[0], (NB, 3, 3, C, C), jnp.float32) * s,
        'b1':  jax.random.normal(ks[1], (NB, C), jnp.float32) * s,
        'w2':  jax.random.normal(ks[2], (NB, 3, 3, C, C), jnp.float32) * s,
        'b2':  jax.random.normal(ks[3], (NB, C), jnp.float32) * s,
        'cw1': jax.random.normal(ks[4], (NB, C, Cr), jnp.float32) * s,
        'cb1': jax.random.normal(ks[5], (NB, Cr), jnp.float32) * s,
        'cw2': jax.random.normal(ks[6], (NB, Cr, C), jnp.float32) * s,
        'cb2': jax.random.normal(ks[7], (NB, C), jnp.float32) * s,
        'wt':  jax.random.normal(ks[8], (3, 3, C, C), jnp.float32) * s,
        'bt':  jax.random.normal(ks[9], (1, C), jnp.float32) * s,
    }

    x_nchw = jax.random.normal(ks[10], (N, C, H, W), jnp.float32)

    ref = jnp.transpose(
        residual_group_ref(jnp.transpose(x_nchw, (0, 2, 3, 1)), params),
        (0, 3, 1, 2))

    # Default config: 2 grid steps x 1 image each (both v7x TensorCores busy).
    out = jax.block_until_ready(residual_group(x_nchw, params))
    assert out.shape == (N, C, H, W)
    # Conv matmuls use bf16 inputs (f32 accumulation) on the MXU, hence the
    # relaxed tolerance vs the pure-f32 reference.
    assert jnp.allclose(out, ref, atol=3e-2, rtol=3e-2), "mismatch (default)"

    # Lane-batched config: 1 grid step carrying both images on lanes
    # (the single-TC v5e/v6e configuration).
    out2 = jax.block_until_ready(
        residual_group(x_nchw, params, images_per_block=N))
    assert out2.shape == (N, C, H, W)
    assert jnp.allclose(out2, ref, atol=3e-2, rtol=3e-2), "mismatch (batched)"

    print("KERNEL_OK")
</pallas_src>

<mosaic_0001>
module attributes {stable_mosaic.version = 11 : i64} {
  func.func @_residual_group_kernel(%arg0: i32, %arg1: memref<1x16x384xf32, #tpu.memory_space<vmem>>, %arg2: memref<1x384xf32, #tpu.memory_space<vmem>>, %arg3: memref<2x48x48xbf16, #tpu.memory_space<vmem>>, %arg4: memref<2x16x1xf32, #tpu.memory_space<vmem>>, %arg5: memref<2x48x48xbf16, #tpu.memory_space<vmem>>, %arg6: memref<2x16x1xf32, #tpu.memory_space<vmem>>, %arg7: memref<2x16x4xf32, #tpu.memory_space<vmem>>, %arg8: memref<2x1x4xf32, #tpu.memory_space<vmem>>, %arg9: memref<2x16x4xf32, #tpu.memory_space<vmem>>, %arg10: memref<2x16x1xf32, #tpu.memory_space<vmem>>, %arg11: memref<48x48xbf16, #tpu.memory_space<vmem>>, %arg12: memref<16x1xf32, #tpu.memory_space<vmem>>, %arg13: memref<1x16x384xf32, #tpu.memory_space<vmem>>, %arg14: memref<16x640xbf16, #tpu.memory_space<vmem>>) attributes {dimension_semantics = [#tpu.dimension_semantics<parallel>], iteration_bounds = array<i64: 2>, scalar_prefetch = 0 : i64, scratch_operands = 1 : i64, tpu.core_type = #tpu.core_type<tc>, window_params = [{transform_indices = @transform_0, window_bounds = array<i64: 1, 16, 384>}, {pipeline_mode = #tpu.pipeline_mode<synchronous>, transform_indices = @transform_1, window_bounds = array<i64: 1, 384>}, {pipeline_mode = #tpu.pipeline_mode<synchronous>, transform_indices = @transform_2, window_bounds = array<i64: 2, 48, 48>}, {pipeline_mode = #tpu.pipeline_mode<synchronous>, transform_indices = @transform_3, window_bounds = array<i64: 2, 16, 1>}, {pipeline_mode = #tpu.pipeline_mode<synchronous>, transform_indices = @transform_4, window_bounds = array<i64: 2, 48, 48>}, {pipeline_mode = #tpu.pipeline_mode<synchronous>, transform_indices = @transform_5, window_bounds = array<i64: 2, 16, 1>}, {pipeline_mode = #tpu.pipeline_mode<synchronous>, transform_indices = @transform_6, window_bounds = array<i64: 2, 16, 4>}, {pipeline_mode = #tpu.pipeline_mode<synchronous>, transform_indices = @transform_7, window_bounds = array<i64: 2, 1, 4>}, {pipeline_mode = #tpu.pipeline_mode<synchronous>, transform_indices = @transform_8, window_bounds = array<i64: 2, 16, 4>}, {pipeline_mode = #tpu.pipeline_mode<synchronous>, transform_indices = @transform_9, window_bounds = array<i64: 2, 16, 1>}, {pipeline_mode = #tpu.pipeline_mode<synchronous>, transform_indices = @transform_10, window_bounds = array<i64: 48, 48>}, {pipeline_mode = #tpu.pipeline_mode<synchronous>, transform_indices = @transform_11, window_bounds = array<i64: 16, 1>}, {transform_indices = @transform_12, window_bounds = array<i64: 1, 16, 384>}]} {
    %c0 = arith.constant 0 : index
    %c0_0 = arith.constant 0 : index
    %0 = vector.load %arg2[%c0, %c0_0] : memref<1x384xf32, #tpu.memory_space<vmem>>, vector<1x384xf32>
    %cst = arith.constant 0.000000e+00 : bf16
    %1 = vector.broadcast %cst : bf16 to vector<16x640xbf16>
    %c0_1 = arith.constant 0 : index
    %c0_2 = arith.constant 0 : index
    %2 = vector.load %arg14[%c0_1, %c0_2] : memref<16x640xbf16, #tpu.memory_space<vmem>>, vector<16x640xbf16>
    tpu.vector_store %arg14[%c0_1, %c0_2], %1 {strides = array<i32>} : memref<16x640xbf16, #tpu.memory_space<vmem>>, vector<16x640xbf16>,
    %c0_3 = arith.constant 0 : index
    %c0_4 = arith.constant 0 : index
    %c0_5 = arith.constant 0 : index
    %3 = vector.load %arg1[%c0_3, %c0_4, %c0_5] : memref<1x16x384xf32, #tpu.memory_space<vmem>>, vector<1x16x384xf32>
    %4 = vector.shape_cast %3 : vector<1x16x384xf32> to vector<16x384xf32>
    %5 = vector.broadcast %0 : vector<1x384xf32> to vector<16x384xf32>
    %6 = arith.mulf %4, %5 : vector<16x384xf32>
    %7 = arith.truncf %6 : vector<16x384xf32> to vector<16x384xbf16>
    %c0_6 = arith.constant 0 : index
    %c128 = arith.constant 128 : index
    %8 = vector.load %arg14[%c0_6, %c128] : memref<16x640xbf16, #tpu.memory_space<vmem>>, vector<16x384xbf16>
    tpu.vector_store %arg14[%c0_6, %c128], %7 {strides = array<i32>} : memref<16x640xbf16, #tpu.memory_space<vmem>>, vector<16x384xbf16>,
    %c0_7 = arith.constant 0 : index
    %c0_8 = arith.constant 0 : index
    %c0_9 = arith.constant 0 : index
    %9 = vector.load %arg3[%c0_7, %c0_8, %c0_9] : memref<2x48x48xbf16, #tpu.memory_space<vmem>>, vector<1x48x48xbf16>
    %10 = vector.shape_cast %9 : vector<1x48x48xbf16> to vector<48x48xbf16>
    %c0_10 = arith.constant 0 : index
    %c0_11 = arith.constant 0 : index
    %c0_12 = arith.constant 0 : index
    %11 = vector.load %arg4[%c0_10, %c0_11, %c0_12] : memref<2x16x1xf32, #tpu.memory_space<vmem>>, vector<1x16x1xf32>
    %12 = vector.shape_cast %11 : vector<1x16x1xf32> to vector<16x1xf32>
    %c0_13 = arith.constant 0 : index
    %c110 = arith.constant 110 : index
    %13 = vector.load %arg14[%c0_13, %c110] : memref<16x640xbf16, #tpu.memory_space<vmem>>, vector<16x384xbf16>
    %c0_14 = arith.constant 0 : index
    %c128_15 = arith.constant 128 : index
    %14 = vector.load %arg14[%c0_14, %c128_15] : memref<16x640xbf16, #tpu.memory_space<vmem>>, vector<16x384xbf16>
    %c0_16 = arith.constant 0 : index
    %c146 = arith.constant 146 : index
    %15 = vector.load %arg14[%c0_16, %c146] : memref<16x640xbf16, #tpu.memory_space<vmem>>, vector<16x384xbf16>
    %16 = tpu.concatenate %13, %14, %15 in 0 : vector<16x384xbf16>, vector<16x384xbf16>, vector<16x384xbf16> -> vector<48x384xbf16>
    %cst_17 = arith.constant dense<0.000000e+00> : vector<48x384xf32>
    %17 = tpu.matmul %10, %16, %cst_17 {dimension_numbers = #tpu.dot_dimension_numbers<[1], [0], [0], [1], [0, 0, 1, 1], [], []>} : vector<48x48xbf16>, vector<48x384xbf16>, vector<48x384xf32> -> vector<48x384xf32>
    %18 = vector.extract_strided_slice %17 {offsets = [16, 0], sizes = [16, 384], strides = [1, 1]} : vector<48x384xf32> to vector<16x384xf32>
    %19 = vector.extract_strided_slice %17 {offsets = [0, 0], sizes = [16, 384], strides = [1, 1]} : vector<48x384xf32> to vector<16x384xf32>
    %20 = vector.extract_strided_slice %19 {offsets = [0, 383], sizes = [16, 1], strides = [1, 1]} : vector<16x384xf32> to vector<16x1xf32>
    %21 = vector.extract_strided_slice %19 {offsets = [0, 0], sizes = [16, 383], strides = [1, 1]} : vector<16x384xf32> to vector<16x383xf32>
    %22 = tpu.concatenate %20, %21 in 1 : vector<16x1xf32>, vector<16x383xf32> -> vector<16x384xf32>
    %23 = arith.addf %18, %22 : vector<16x384xf32>
    %24 = vector.extract_strided_slice %17 {offsets = [32, 0], sizes = [16, 384], strides = [1, 1]} : vector<48x384xf32> to vector<16x384xf32>
    %25 = vector.extract_strided_slice %24 {offsets = [0, 1], sizes = [16, 383], strides = [1, 1]} : vector<16x384xf32> to vector<16x383xf32>
    %26 = vector.extract_strided_slice %24 {offsets = [0, 0], sizes = [16, 1], strides = [1, 1]} : vector<16x384xf32> to vector<16x1xf32>
    %27 = tpu.concatenate %25, %26 in 1 : vector<16x383xf32>, vector<16x1xf32> -> vector<16x384xf32>
    %28 = arith.addf %23, %27 : vector<16x384xf32>
    %29 = vector.broadcast %12 : vector<16x1xf32> to vector<16x384xf32>
    %30 = arith.addf %28, %29 : vector<16x384xf32>
    %cst_18 = arith.constant 0.000000e+00 : f32
    %31 = vector.broadcast %cst_18 : f32 to vector<16x384xf32>
    %32 = arith.maximumf %30, %31 : vector<16x384xf32>
    %33 = vector.broadcast %0 : vector<1x384xf32> to vector<16x384xf32>
    %34 = arith.mulf %32, %33 : vector<16x384xf32>
    %35 = arith.truncf %34 : vector<16x384xf32> to vector<16x384xbf16>
    %c0_19 = arith.constant 0 : index
    %c128_20 = arith.constant 128 : index
    %36 = vector.load %arg14[%c0_19, %c128_20] : memref<16x640xbf16, #tpu.memory_space<vmem>>, vector<16x384xbf16>
    tpu.vector_store %arg14[%c0_19, %c128_20], %35 {strides = array<i32>} : memref<16x640xbf16, #tpu.memory_space<vmem>>, vector<16x384xbf16>,
    %c0_21 = arith.constant 0 : index
    %c0_22 = arith.constant 0 : index
    %c0_23 = arith.constant 0 : index
    %37 = vector.load %arg5[%c0_21, %c0_22, %c0_23] : memref<2x48x48xbf16, #tpu.memory_space<vmem>>, vector<1x48x48xbf16>
    %38 = vector.shape_cast %37 : vector<1x48x48xbf16> to vector<48x48xbf16>
    %c0_24 = arith.constant 0 : index
    %c0_25 = arith.constant 0 : index
    %c0_26 = arith.constant 0 : index
    %39 = vector.load %arg6[%c0_24, %c0_25, %c0_26] : memref<2x16x1xf32, #tpu.memory_space<vmem>>, vector<1x16x1xf32>
    %40 = vector.shape_cast %39 : vector<1x16x1xf32> to vector<16x1xf32>
    %c0_27 = arith.constant 0 : index
    %c110_28 = arith.constant 110 : index
    %41 = vector.load %arg14[%c0_27, %c110_28] : memref<16x640xbf16, #tpu.memory_space<vmem>>, vector<16x384xbf16>
    %c0_29 = arith.constant 0 : index
    %c128_30 = arith.constant 128 : index
    %42 = vector.load %arg14[%c0_29, %c128_30] : memref<16x640xbf16, #tpu.memory_space<vmem>>, vector<16x384xbf16>
    %c0_31 = arith.constant 0 : index
    %c146_32 = arith.constant 146 : index
    %43 = vector.load %arg14[%c0_31, %c146_32] : memref<16x640xbf16, #tpu.memory_space<vmem>>, vector<16x384xbf16>
    %44 = tpu.concatenate %41, %42, %43 in 0 : vector<16x384xbf16>, vector<16x384xbf16>, vector<16x384xbf16> -> vector<48x384xbf16>
    %cst_33 = arith.constant dense<0.000000e+00> : vector<48x384xf32>
    %45 = tpu.matmul %38, %44, %cst_33 {dimension_numbers = #tpu.dot_dimension_numbers<[1], [0], [0], [1], [0, 0, 1, 1], [], []>} : vector<48x48xbf16>, vector<48x384xbf16>, vector<48x384xf32> -> vector<48x384xf32>
    %46 = vector.extract_strided_slice %45 {offsets = [16, 0], sizes = [16, 384], strides = [1, 1]} : vector<48x384xf32> to vector<16x384xf32>
    %47 = vector.extract_strided_slice %45 {offsets = [0, 0], sizes = [16, 384], strides = [1, 1]} : vector<48x384xf32> to vector<16x384xf32>
    %48 = vector.extract_strided_slice %47 {offsets = [0, 383], sizes = [16, 1], strides = [1, 1]} : vector<16x384xf32> to vector<16x1xf32>
    %49 = vector.extract_strided_slice %47 {offsets = [0, 0], sizes = [16, 383], strides = [1, 1]} : vector<16x384xf32> to vector<16x383xf32>
    %50 = tpu.concatenate %48, %49 in 1 : vector<16x1xf32>, vector<16x383xf32> -> vector<16x384xf32>
    %51 = arith.addf %46, %50 : vector<16x384xf32>
    %52 = vector.extract_strided_slice %45 {offsets = [32, 0], sizes = [16, 384], strides = [1, 1]} : vector<48x384xf32> to vector<16x384xf32>
    %53 = vector.extract_strided_slice %52 {offsets = [0, 1], sizes = [16, 383], strides = [1, 1]} : vector<16x384xf32> to vector<16x383xf32>
    %54 = vector.extract_strided_slice %52 {offsets = [0, 0], sizes = [16, 1], strides = [1, 1]} : vector<16x384xf32> to vector<16x1xf32>
    %55 = tpu.concatenate %53, %54 in 1 : vector<16x383xf32>, vector<16x1xf32> -> vector<16x384xf32>
    %56 = arith.addf %51, %55 : vector<16x384xf32>
    %57 = vector.broadcast %40 : vector<16x1xf32> to vector<16x384xf32>
    %58 = arith.addf %56, %57 : vector<16x384xf32>
    %59 = vector.broadcast %0 : vector<1x384xf32> to vector<16x384xf32>
    %60 = arith.mulf %58, %59 : vector<16x384xf32>
    %c0_34 = arith.constant 0 : index
    %c0_35 = arith.constant 0 : index
    %c0_36 = arith.constant 0 : index
    %61 = vector.load %arg7[%c0_34, %c0_35, %c0_36] : memref<2x16x4xf32, #tpu.memory_space<vmem>>, vector<1x16x4xf32>
    %62 = vector.shape_cast %61 : vector<1x16x4xf32> to vector<16x4xf32>
    %c0_37 = arith.constant 0 : index
    %c0_38 = arith.constant 0 : index
    %c0_39 = arith.constant 0 : index
    %63 = vector.load %arg8[%c0_37, %c0_38, %c0_39] : memref<2x1x4xf32, #tpu.memory_space<vmem>>, vector<1x1x4xf32>
    %64 = vector.shape_cast %63 : vector<1x1x4xf32> to vector<1x4xf32>
    %c0_40 = arith.constant 0 : index
    %c0_41 = arith.constant 0 : index
    %c0_42 = arith.constant 0 : index
    %65 = vector.load %arg9[%c0_40, %c0_41, %c0_42] : memref<2x16x4xf32, #tpu.memory_space<vmem>>, vector<1x16x4xf32>
    %66 = vector.shape_cast %65 : vector<1x16x4xf32> to vector<16x4xf32>
    %c0_43 = arith.constant 0 : index
    %c0_44 = arith.constant 0 : index
    %c0_45 = arith.constant 0 : index
    %67 = vector.load %arg10[%c0_43, %c0_44, %c0_45] : memref<2x16x1xf32, #tpu.memory_space<vmem>>, vector<1x16x1xf32>
    %68 = vector.shape_cast %67 : vector<1x16x1xf32> to vector<16x1xf32>
    %cst_46 = arith.constant dense<0.000000e+00> : vector<16xf32>
    %69 = vector.multi_reduction <add>, %60, %cst_46 [1] : vector<16x384xf32> to vector<16xf32>
    %70 = vector.shape_cast %69 : vector<16xf32> to vector<16x1xf32>
    %cst_47 = arith.constant 3.906250e-03 : f32
    %71 = vector.broadcast %cst_47 : f32 to vector<16x1xf32>
    %72 = arith.mulf %70, %71 : vector<16x1xf32>
    %73 = vector.broadcast %72 : vector<16x1xf32> to vector<16x4xf32>
    %74 = arith.mulf %62, %73 : vector<16x4xf32>
    %cst_48 = arith.constant dense<0.000000e+00> : vector<4xf32>
    %75 = vector.multi_reduction <add>, %74, %cst_48 [0] : vector<16x4xf32> to vector<4xf32>
    %76 = vector.shape_cast %75 : vector<4xf32> to vector<1x4xf32>
    %77 = arith.addf %76, %64 : vector<1x4xf32>
    %cst_49 = arith.constant 0.000000e+00 : f32
    %78 = vector.broadcast %cst_49 : f32 to vector<1x4xf32>
    %79 = arith.maximumf %77, %78 : vector<1x4xf32>
    %80 = vector.broadcast %79 : vector<1x4xf32> to vector<16x4xf32>
    %81 = arith.mulf %66, %80 : vector<16x4xf32>
    %cst_50 = arith.constant dense<0.000000e+00> : vector<16xf32>
    %82 = vector.multi_reduction <add>, %81, %cst_50 [1] : vector<16x4xf32> to vector<16xf32>
    %83 = vector.shape_cast %82 : vector<16xf32> to vector<16x1xf32>
    %84 = arith.addf %83, %68 : vector<16x1xf32>
    %85 = arith.negf %84 : vector<16x1xf32>
    %86 = math.exp %85 : vector<16x1xf32>
    %cst_51 = arith.constant 1.000000e+00 : f32
    %87 = vector.broadcast %cst_51 : f32 to vector<16x1xf32>
    %88 = arith.addf %87, %86 : vector<16x1xf32>
    %89 = arith.divf %87, %88 : vector<16x1xf32>
    %90 = vector.broadcast %89 : vector<16x1xf32> to vector<16x384xf32>
    %91 = arith.mulf %60, %90 : vector<16x384xf32>
    %92 = arith.addf %6, %91 : vector<16x384xf32>
    %93 = arith.truncf %92 : vector<16x384xf32> to vector<16x384xbf16>
    %c0_52 = arith.constant 0 : index
    %c128_53 = arith.constant 128 : index
    %94 = vector.load %arg14[%c0_52, %c128_53] : memref<16x640xbf16, #tpu.memory_space<vmem>>, vector<16x384xbf16>
    tpu.vector_store %arg14[%c0_52, %c128_53], %93 {strides = array<i32>} : memref<16x640xbf16, #tpu.memory_space<vmem>>, vector<16x384xbf16>,
    %c1 = arith.constant 1 : index
    %c0_54 = arith.constant 0 : index
    %c0_55 = arith.constant 0 : index
    %95 = vector.load %arg3[%c1, %c0_54, %c0_55] : memref<2x48x48xbf16, #tpu.memory_space<vmem>>, vector<1x48x48xbf16>
    %96 = vector.shape_cast %95 : vector<1x48x48xbf16> to vector<48x48xbf16>
    %c1_56 = arith.constant 1 : index
    %c0_57 = arith.constant 0 : index
    %c0_58 = arith.constant 0 : index
    %97 = vector.load %arg4[%c1_56, %c0_57, %c0_58] : memref<2x16x1xf32, #tpu.memory_space<vmem>>, vector<1x16x1xf32>
    %98 = vector.shape_cast %97 : vector<1x16x1xf32> to vector<16x1xf32>
    %c0_59 = arith.constant 0 : index
    %c110_60 = arith.constant 110 : index
    %99 = vector.load %arg14[%c0_59, %c110_60] : memref<16x640xbf16, #tpu.memory_space<vmem>>, vector<16x384xbf16>
    %c0_61 = arith.constant 0 : index
    %c128_62 = arith.constant 128 : index
    %100 = vector.load %arg14[%c0_61, %c128_62] : memref<16x640xbf16, #tpu.memory_space<vmem>>, vector<16x384xbf16>
    %c0_63 = arith.constant 0 : index
    %c146_64 = arith.constant 146 : index
    %101 = vector.load %arg14[%c0_63, %c146_64] : memref<16x640xbf16, #tpu.memory_space<vmem>>, vector<16x384xbf16>
    %102 = tpu.concatenate %99, %100, %101 in 0 : vector<16x384xbf16>, vector<16x384xbf16>, vector<16x384xbf16> -> vector<48x384xbf16>
    %cst_65 = arith.constant dense<0.000000e+00> : vector<48x384xf32>
    %103 = tpu.matmul %96, %102, %cst_65 {dimension_numbers = #tpu.dot_dimension_numbers<[1], [0], [0], [1], [0, 0, 1, 1], [], []>} : vector<48x48xbf16>, vector<48x384xbf16>, vector<48x384xf32> -> vector<48x384xf32>
    %104 = vector.extract_strided_slice %103 {offsets = [16, 0], sizes = [16, 384], strides = [1, 1]} : vector<48x384xf32> to vector<16x384xf32>
    %105 = vector.extract_strided_slice %103 {offsets = [0, 0], sizes = [16, 384], strides = [1, 1]} : vector<48x384xf32> to vector<16x384xf32>
    %106 = vector.extract_strided_slice %105 {offsets = [0, 383], sizes = [16, 1], strides = [1, 1]} : vector<16x384xf32> to vector<16x1xf32>
    %107 = vector.extract_strided_slice %105 {offsets = [0, 0], sizes = [16, 383], strides = [1, 1]} : vector<16x384xf32> to vector<16x383xf32>
    %108 = tpu.concatenate %106, %107 in 1 : vector<16x1xf32>, vector<16x383xf32> -> vector<16x384xf32>
    %109 = arith.addf %104, %108 : vector<16x384xf32>
    %110 = vector.extract_strided_slice %103 {offsets = [32, 0], sizes = [16, 384], strides = [1, 1]} : vector<48x384xf32> to vector<16x384xf32>
    %111 = vector.extract_strided_slice %110 {offsets = [0, 1], sizes = [16, 383], strides = [1, 1]} : vector<16x384xf32> to vector<16x383xf32>
    %112 = vector.extract_strided_slice %110 {offsets = [0, 0], sizes = [16, 1], strides = [1, 1]} : vector<16x384xf32> to vector<16x1xf32>
    %113 = tpu.concatenate %111, %112 in 1 : vector<16x383xf32>, vector<16x1xf32> -> vector<16x384xf32>
    %114 = arith.addf %109, %113 : vector<16x384xf32>
    %115 = vector.broadcast %98 : vector<16x1xf32> to vector<16x384xf32>
    %116 = arith.addf %114, %115 : vector<16x384xf32>
    %cst_66 = arith.constant 0.000000e+00 : f32
    %117 = vector.broadcast %cst_66 : f32 to vector<16x384xf32>
    %118 = arith.maximumf %116, %117 : vector<16x384xf32>
    %119 = vector.broadcast %0 : vector<1x384xf32> to vector<16x384xf32>
    %120 = arith.mulf %118, %119 : vector<16x384xf32>
    %121 = arith.truncf %120 : vector<16x384xf32> to vector<16x384xbf16>
    %c0_67 = arith.constant 0 : index
    %c128_68 = arith.constant 128 : index
    %122 = vector.load %arg14[%c0_67, %c128_68] : memref<16x640xbf16, #tpu.memory_space<vmem>>, vector<16x384xbf16>
    tpu.vector_store %arg14[%c0_67, %c128_68], %121 {strides = array<i32>} : memref<16x640xbf16, #tpu.memory_space<vmem>>, vector<16x384xbf16>,
    %c1_69 = arith.constant 1 : index
    %c0_70 = arith.constant 0 : index
    %c0_71 = arith.constant 0 : index
    %123 = vector.load %arg5[%c1_69, %c0_70, %c0_71] : memref<2x48x48xbf16, #tpu.memory_space<vmem>>, vector<1x48x48xbf16>
    %124 = vector.shape_cast %123 : vector<1x48x48xbf16> to vector<48x48xbf16>
    %c1_72 = arith.constant 1 : index
    %c0_73 = arith.constant 0 : index
    %c0_74 = arith.constant 0 : index
    %125 = vector.load %arg6[%c1_72, %c0_73, %c0_74] : memref<2x16x1xf32, #tpu.memory_space<vmem>>, vector<1x16x1xf32>
    %126 = vector.shape_cast %125 : vector<1x16x1xf32> to vector<16x1xf32>
    %c0_75 = arith.constant 0 : index
    %c110_76 = arith.constant 110 : index
    %127 = vector.load %arg14[%c0_75, %c110_76] : memref<16x640xbf16, #tpu.memory_space<vmem>>, vector<16x384xbf16>
    %c0_77 = arith.constant 0 : index
    %c128_78 = arith.constant 128 : index
    %128 = vector.load %arg14[%c0_77, %c128_78] : memref<16x640xbf16, #tpu.memory_space<vmem>>, vector<16x384xbf16>
    %c0_79 = arith.constant 0 : index
    %c146_80 = arith.constant 146 : index
    %129 = vector.load %arg14[%c0_79, %c146_80] : memref<16x640xbf16, #tpu.memory_space<vmem>>, vector<16x384xbf16>
    %130 = tpu.concatenate %127, %128, %129 in 0 : vector<16x384xbf16>, vector<16x384xbf16>, vector<16x384xbf16> -> vector<48x384xbf16>
    %cst_81 = arith.constant dense<0.000000e+00> : vector<48x384xf32>
    %131 = tpu.matmul %124, %130, %cst_81 {dimension_numbers = #tpu.dot_dimension_numbers<[1], [0], [0], [1], [0, 0, 1, 1], [], []>} : vector<48x48xbf16>, vector<48x384xbf16>, vector<48x384xf32> -> vector<48x384xf32>
    %132 = vector.extract_strided_slice %131 {offsets = [16, 0], sizes = [16, 384], strides = [1, 1]} : vector<48x384xf32> to vector<16x384xf32>
    %133 = vector.extract_strided_slice %131 {offsets = [0, 0], sizes = [16, 384], strides = [1, 1]} : vector<48x384xf32> to vector<16x384xf32>
    %134 = vector.extract_strided_slice %133 {offsets = [0, 383], sizes = [16, 1], strides = [1, 1]} : vector<16x384xf32> to vector<16x1xf32>
    %135 = vector.extract_strided_slice %133 {offsets = [0, 0], sizes = [16, 383], strides = [1, 1]} : vector<16x384xf32> to vector<16x383xf32>
    %136 = tpu.concatenate %134, %135 in 1 : vector<16x1xf32>, vector<16x383xf32> -> vector<16x384xf32>
    %137 = arith.addf %132, %136 : vector<16x384xf32>
    %138 = vector.extract_strided_slice %131 {offsets = [32, 0], sizes = [16, 384], strides = [1, 1]} : vector<48x384xf32> to vector<16x384xf32>
    %139 = vector.extract_strided_slice %138 {offsets = [0, 1], sizes = [16, 383], strides = [1, 1]} : vector<16x384xf32> to vector<16x383xf32>
    %140 = vector.extract_strided_slice %138 {offsets = [0, 0], sizes = [16, 1], strides = [1, 1]} : vector<16x384xf32> to vector<16x1xf32>
    %141 = tpu.concatenate %139, %140 in 1 : vector<16x383xf32>, vector<16x1xf32> -> vector<16x384xf32>
    %142 = arith.addf %137, %141 : vector<16x384xf32>
    %143 = vector.broadcast %126 : vector<16x1xf32> to vector<16x384xf32>
    %144 = arith.addf %142, %143 : vector<16x384xf32>
    %145 = vector.broadcast %0 : vector<1x384xf32> to vector<16x384xf32>
    %146 = arith.mulf %144, %145 : vector<16x384xf32>
    %c1_82 = arith.constant 1 : index
    %c0_83 = arith.constant 0 : index
    %c0_84 = arith.constant 0 : index
    %147 = vector.load %arg7[%c1_82, %c0_83, %c0_84] : memref<2x16x4xf32, #tpu.memory_space<vmem>>, vector<1x16x4xf32>
    %148 = vector.shape_cast %147 : vector<1x16x4xf32> to vector<16x4xf32>
    %c1_85 = arith.constant 1 : index
    %c0_86 = arith.constant 0 : index
    %c0_87 = arith.constant 0 : index
    %149 = vector.load %arg8[%c1_85, %c0_86, %c0_87] : memref<2x1x4xf32, #tpu.memory_space<vmem>>, vector<1x1x4xf32>
    %150 = vector.shape_cast %149 : vector<1x1x4xf32> to vector<1x4xf32>
    %c1_88 = arith.constant 1 : index
    %c0_89 = arith.constant 0 : index
    %c0_90 = arith.constant 0 : index
    %151 = vector.load %arg9[%c1_88, %c0_89, %c0_90] : memref<2x16x4xf32, #tpu.memory_space<vmem>>, vector<1x16x4xf32>
    %152 = vector.shape_cast %151 : vector<1x16x4xf32> to vector<16x4xf32>
    %c1_91 = arith.constant 1 : index
    %c0_92 = arith.constant 0 : index
    %c0_93 = arith.constant 0 : index
    %153 = vector.load %arg10[%c1_91, %c0_92, %c0_93] : memref<2x16x1xf32, #tpu.memory_space<vmem>>, vector<1x16x1xf32>
    %154 = vector.shape_cast %153 : vector<1x16x1xf32> to vector<16x1xf32>
    %cst_94 = arith.constant dense<0.000000e+00> : vector<16xf32>
    %155 = vector.multi_reduction <add>, %146, %cst_94 [1] : vector<16x384xf32> to vector<16xf32>
    %156 = vector.shape_cast %155 : vector<16xf32> to vector<16x1xf32>
    %cst_95 = arith.constant 3.906250e-03 : f32
    %157 = vector.broadcast %cst_95 : f32 to vector<16x1xf32>
    %158 = arith.mulf %156, %157 : vector<16x1xf32>
    %159 = vector.broadcast %158 : vector<16x1xf32> to vector<16x4xf32>
    %160 = arith.mulf %148, %159 : vector<16x4xf32>
    %cst_96 = arith.constant dense<0.000000e+00> : vector<4xf32>
    %161 = vector.multi_reduction <add>, %160, %cst_96 [0] : vector<16x4xf32> to vector<4xf32>
    %162 = vector.shape_cast %161 : vector<4xf32> to vector<1x4xf32>
    %163 = arith.addf %162, %150 : vector<1x4xf32>
    %cst_97 = arith.constant 0.000000e+00 : f32
    %164 = vector.broadcast %cst_97 : f32 to vector<1x4xf32>
    %165 = arith.maximumf %163, %164 : vector<1x4xf32>
    %166 = vector.broadcast %165 : vector<1x4xf32> to vector<16x4xf32>
    %167 = arith.mulf %152, %166 : vector<16x4xf32>
    %cst_98 = arith.constant dense<0.000000e+00> : vector<16xf32>
    %168 = vector.multi_reduction <add>, %167, %cst_98 [1] : vector<16x4xf32> to vector<16xf32>
    %169 = vector.shape_cast %168 : vector<16xf32> to vector<16x1xf32>
    %170 = arith.addf %169, %154 : vector<16x1xf32>
    %171 = arith.negf %170 : vector<16x1xf32>
    %172 = math.exp %171 : vector<16x1xf32>
    %cst_99 = arith.constant 1.000000e+00 : f32
    %173 = vector.broadcast %cst_99 : f32 to vector<16x1xf32>
    %174 = arith.addf %173, %172 : vector<16x1xf32>
    %175 = arith.divf %173, %174 : vector<16x1xf32>
    %176 = vector.broadcast %175 : vector<16x1xf32> to vector<16x384xf32>
    %177 = arith.mulf %146, %176 : vector<16x384xf32>
    %178 = arith.addf %92, %177 : vector<16x384xf32>
    %179 = arith.truncf %178 : vector<16x384xf32> to vector<16x384xbf16>
    %c0_100 = arith.constant 0 : index
    %c128_101 = arith.constant 128 : index
    %180 = vector.load %arg14[%c0_100, %c128_101] : memref<16x640xbf16, #tpu.memory_space<vmem>>, vector<16x384xbf16>
    tpu.vector_store %arg14[%c0_100, %c128_101], %179 {strides = array<i32>} : memref<16x640xbf16, #tpu.memory_space<vmem>>, vector<16x384xbf16>,
    %c0_102 = arith.constant 0 : index
    %c0_103 = arith.constant 0 : index
    %181 = vector.load %arg11[%c0_102, %c0_103] : memref<48x48xbf16, #tpu.memory_space<vmem>>, vector<48x48xbf16>
    %c0_104 = arith.constant 0 : index
    %c0_105 = arith.constant 0 : index
    %182 = vector.load %arg12[%c0_104, %c0_105] : memref<16x1xf32, #tpu.memory_space<vmem>>, vector<16x1xf32>
    %c0_106 = arith.constant 0 : index
    %c110_107 = arith.constant 110 : index
    %183 = vector.load %arg14[%c0_106, %c110_107] : memref<16x640xbf16, #tpu.memory_space<vmem>>, vector<16x384xbf16>
    %c0_108 = arith.constant 0 : index
    %c128_109 = arith.constant 128 : index
    %184 = vector.load %arg14[%c0_108, %c128_109] : memref<16x640xbf16, #tpu.memory_space<vmem>>, vector<16x384xbf16>
    %c0_110 = arith.constant 0 : index
    %c146_111 = arith.constant 146 : index
    %185 = vector.load %arg14[%c0_110, %c146_111] : memref<16x640xbf16, #tpu.memory_space<vmem>>, vector<16x384xbf16>
    %186 = tpu.concatenate %183, %184, %185 in 0 : vector<16x384xbf16>, vector<16x384xbf16>, vector<16x384xbf16> -> vector<48x384xbf16>
    %cst_112 = arith.constant dense<0.000000e+00> : vector<48x384xf32>
    %187 = tpu.matmul %181, %186, %cst_112 {dimension_numbers = #tpu.dot_dimension_numbers<[1], [0], [0], [1], [0, 0, 1, 1], [], []>} : vector<48x48xbf16>, vector<48x384xbf16>, vector<48x384xf32> -> vector<48x384xf32>
    %188 = vector.extract_strided_slice %187 {offsets = [16, 0], sizes = [16, 384], strides = [1, 1]} : vector<48x384xf32> to vector<16x384xf32>
    %189 = vector.extract_strided_slice %187 {offsets = [0, 0], sizes = [16, 384], strides = [1, 1]} : vector<48x384xf32> to vector<16x384xf32>
    %190 = vector.extract_strided_slice %189 {offsets = [0, 383], sizes = [16, 1], strides = [1, 1]} : vector<16x384xf32> to vector<16x1xf32>
    %191 = vector.extract_strided_slice %189 {offsets = [0, 0], sizes = [16, 383], strides = [1, 1]} : vector<16x384xf32> to vector<16x383xf32>
    %192 = tpu.concatenate %190, %191 in 1 : vector<16x1xf32>, vector<16x383xf32> -> vector<16x384xf32>
    %193 = arith.addf %188, %192 : vector<16x384xf32>
    %194 = vector.extract_strided_slice %187 {offsets = [32, 0], sizes = [16, 384], strides = [1, 1]} : vector<48x384xf32> to vector<16x384xf32>
    %195 = vector.extract_strided_slice %194 {offsets = [0, 1], sizes = [16, 383], strides = [1, 1]} : vector<16x384xf32> to vector<16x383xf32>
    %196 = vector.extract_strided_slice %194 {offsets = [0, 0], sizes = [16, 1], strides = [1, 1]} : vector<16x384xf32> to vector<16x1xf32>
    %197 = tpu.concatenate %195, %196 in 1 : vector<16x383xf32>, vector<16x1xf32> -> vector<16x384xf32>
    %198 = arith.addf %193, %197 : vector<16x384xf32>
    %199 = vector.broadcast %182 : vector<16x1xf32> to vector<16x384xf32>
    %200 = arith.addf %198, %199 : vector<16x384xf32>
    %201 = arith.addf %200, %6 : vector<16x384xf32>
    %202 = vector.broadcast %0 : vector<1x384xf32> to vector<16x384xf32>
    %203 = arith.mulf %201, %202 : vector<16x384xf32>
    %c0_113 = arith.constant 0 : index
    %c0_114 = arith.constant 0 : index
    %c0_115 = arith.constant 0 : index
    %204 = vector.load %arg13[%c0_113, %c0_114, %c0_115] : memref<1x16x384xf32, #tpu.memory_space<vmem>>, vector<1x16x384xf32>
    %205 = vector.shape_cast %204 : vector<1x16x384xf32> to vector<16x384xf32>
    %206 = vector.shape_cast %203 : vector<16x384xf32> to vector<1x16x384xf32>
    tpu.vector_store %arg13[%c0_113, %c0_114, %c0_115], %206 {strides = array<i32>} : memref<1x16x384xf32, #tpu.memory_space<vmem>>, vector<1x16x384xf32>,
    return
  }
  func.func @transform_0(%arg0: i32) -> (i32, i32, i32) {
    %c0_i32 = arith.constant 0 : i32
    %c0_i32_0 = arith.constant 0 : i32
    %c0_i32_1 = arith.constant 0 : i32
    return %arg0, %c0_i32, %c0_i32_0 : i32, i32, i32
  }
  func.func @transform_1(%arg0: i32) -> (i32, i32) {
    %c0_i32 = arith.constant 0 : i32
    %c0_i32_0 = arith.constant 0 : i32
    %c0_i32_1 = arith.constant 0 : i32
    return %c0_i32, %c0_i32_0 : i32, i32
  }
  func.func @transform_2(%arg0: i32) -> (i32, i32, i32) {
    %c0_i32 = arith.constant 0 : i32
    %c0_i32_0 = arith.constant 0 : i32
    %c0_i32_1 = arith.constant 0 : i32
    %c0_i32_2 = arith.constant 0 : i32
    return %c0_i32, %c0_i32_0, %c0_i32_1 : i32, i32, i32
  }
  func.func @transform_3(%arg0: i32) -> (i32, i32, i32) {
    %c0_i32 = arith.constant 0 : i32
    %c0_i32_0 = arith.constant 0 : i32
    %c0_i32_1 = arith.constant 0 : i32
    %c0_i32_2 = arith.constant 0 : i32
    return %c0_i32, %c0_i32_0, %c0_i32_1 : i32, i32, i32
  }
  func.func @transform_4(%arg0: i32) -> (i32, i32, i32) {
    %c0_i32 = arith.constant 0 : i32
    %c0_i32_0 = arith.constant 0 : i32
    %c0_i32_1 = arith.constant 0 : i32
    %c0_i32_2 = arith.constant 0 : i32
    return %c0_i32, %c0_i32_0, %c0_i32_1 : i32, i32, i32
  }
  func.func @transform_5(%arg0: i32) -> (i32, i32, i32) {
    %c0_i32 = arith.constant 0 : i32
    %c0_i32_0 = arith.constant 0 : i32
    %c0_i32_1 = arith.constant 0 : i32
    %c0_i32_2 = arith.constant 0 : i32
    return %c0_i32, %c0_i32_0, %c0_i32_1 : i32, i32, i32
  }
  func.func @transform_6(%arg0: i32) -> (i32, i32, i32) {
    %c0_i32 = arith.constant 0 : i32
    %c0_i32_0 = arith.constant 0 : i32
    %c0_i32_1 = arith.constant 0 : i32
    %c0_i32_2 = arith.constant 0 : i32
    return %c0_i32, %c0_i32_0, %c0_i32_1 : i32, i32, i32
  }
  func.func @transform_7(%arg0: i32) -> (i32, i32, i32) {
    %c0_i32 = arith.constant 0 : i32
    %c0_i32_0 = arith.constant 0 : i32
    %c0_i32_1 = arith.constant 0 : i32
    %c0_i32_2 = arith.constant 0 : i32
    return %c0_i32, %c0_i32_0, %c0_i32_1 : i32, i32, i32
  }
  func.func @transform_8(%arg0: i32) -> (i32, i32, i32) {
    %c0_i32 = arith.constant 0 : i32
    %c0_i32_0 = arith.constant 0 : i32
    %c0_i32_1 = arith.constant 0 : i32
    %c0_i32_2 = arith.constant 0 : i32
    return %c0_i32, %c0_i32_0, %c0_i32_1 : i32, i32, i32
  }
  func.func @transform_9(%arg0: i32) -> (i32, i32, i32) {
    %c0_i32 = arith.constant 0 : i32
    %c0_i32_0 = arith.constant 0 : i32
    %c0_i32_1 = arith.constant 0 : i32
    %c0_i32_2 = arith.constant 0 : i32
    return %c0_i32, %c0_i32_0, %c0_i32_1 : i32, i32, i32
  }
  func.func @transform_10(%arg0: i32) -> (i32, i32) {
    %c0_i32 = arith.constant 0 : i32
    %c0_i32_0 = arith.constant 0 : i32
    %c0_i32_1 = arith.constant 0 : i32
    return %c0_i32, %c0_i32_0 : i32, i32
  }
  func.func @transform_11(%arg0: i32) -> (i32, i32) {
    %c0_i32 = arith.constant 0 : i32
    %c0_i32_0 = arith.constant 0 : i32
    %c0_i32_1 = arith.constant 0 : i32
    return %c0_i32, %c0_i32_0 : i32, i32
  }
  func.func @transform_12(%arg0: i32) -> (i32, i32, i32) {
    %c0_i32 = arith.constant 0 : i32
    %c0_i32_0 = arith.constant 0 : i32
    %c0_i32_1 = arith.constant 0 : i32
    return %arg0, %c0_i32, %c0_i32_0 : i32, i32, i32
  }
}

</mosaic_0001>

<bundles_post_ra>
// kernel: tpu_custom_call.1
= control target key start
LH: loop header
LB: loop body
LE: loop exit
PB: predicated region body
PF: predicated region fallthrough
CT: control target
= control target key end

     0   :  { %17 = vsyncpa [#allocation4], 0  ;;  %s4182_s0 = inlined_call_operand.vmem [shape: f32[2,16,384], index: 0, kind: input, shape index: {}]   ;;  %s4183_s1 = inlined_call_operand.hbm [shape: f32[1,384], index: 1, kind: input, shape index: {}]   ;;  %s4184_s2 = inlined_call_operand.vmem [shape: bf16[2,48,48], index: 2, kind: input, shape index: {}]   ;;  %s4185_s3 = inlined_call_operand.vmem [shape: f32[2,16,1], index: 3, kind: input, shape index: {}]   ;;  %s4186_s4 = inlined_call_operand.vmem [shape: bf16[2,48,48], index: 4, kind: input, shape index: {}]   ;;  %s4187_s5 = inlined_call_operand.vmem [shape: f32[2,16,1], index: 5, kind: input, shape index: {}]   ;;  %s4188_s6 = inlined_call_operand.vmem [shape: f32[2,16,4], index: 6, kind: input, shape index: {}]   ;;  %s4189_s7 = inlined_call_operand.hbm [shape: f32[2,1,4], index: 7, kind: input, shape index: {}]   ;;  %s4190_s8 = inlined_call_operand.vmem [shape: f32[2,16,4], index: 8, kind: input, shape index: {}]   ;;  %s4191_s9 = inlined_call_operand.vmem [shape: f32[2,16,1], index: 9, kind: input, shape index: {}]   ;;  %s4192_s10 = inlined_call_operand.vmem [shape: bf16[48,48], index: 10, kind: input, shape index: {}]   ;;  %s4193_s11 = inlined_call_operand.vmem [shape: f32[16,1], index: 11, kind: input, shape index: {}]   ;;  %s4194_s12 = inlined_call_operand.hbm [shape: f32[2,16,384], index: 12, kind: output, shape index: {}]  }
   0x1   :  { %18 = vsyncpa [#allocation7], 0 }
   0x2   :  { %19 = vsyncpa [#allocation5], 0 }
   0x3   :  { %21 = vsyncpa [#allocation5 + $0x1], 0  ;;  %s3396_s21 = smov 0   ;;  %s3398_s22 = smov 0  }
   0x4   :  { %s3400_s23 = smov 0   ;;  %s3402_s24 = smov 0  }
   0x5 LB: > { %4199 = sst [smem:[#allocation12_spill]] %s3310_s23  ;;  %s3417_s25 = sadd.s32 4294967295, %s3314_s24   ;;  %s3314_s24 = sphi %s3402_s24, %s4216_s24   ;;  %s3310_s23 = sphi %s3400_s23, %s4213_s23   ;;  %s3306_s22 = sphi %s3398_s22, %s4215_s22   ;;  %s3302_s21 = sphi %s3396_s21, %s4214_s21  }
   0x6   : > { %s2729_s26 = sadd.s32 4294967294, %s3314_s24   ;;  %s3421_s27 = sadd.s32 1, %s3314_s24  }
   0x7   : > { %s291_s28 = sadd.s32 1, %s3310_s23  ;;  %s288_s29 = ssub.s32 %s3314_s24, %s3421_s27 }
   0x8   : > { %p301_p0 = scmp.ne.s32.totalorder %s3310_s23, %s3306_s22  ;;  %p289_p1 = scmp.eq.s32.totalorder %s288_s29, 0 }
   0x9   : > { %p302_p2 = scmp.eq.s32.totalorder %s3417_s25, 1  ;;  %p307_p3 = scmp.ne.s32.totalorder %s3306_s22, %s3302_s21 }
   0xa   : > { %p308_p4 = scmp.eq.s32.totalorder %s2729_s26, 1  ;;  %p2730_p7 = scmp.ge.s32.totalorder %s3314_s24, 1 }
   0xb   : > { %s3432_s30 = scalar_select %p289_p1, %s3310_s23, %s291_s28  }
   0xc   : > { %p3434_p5 = por %p302_p2, %p301_p0  ;;  %p3438_p6 = por %p308_p4, %p307_p3 }
   0xd   : > { %4200 = sst [smem:[#allocation13_spill]] %s3432_s30  ;;  %p315_p8 = scmp.lt.s32.totalorder %s3314_s24, 3 }
   0xe   : > { %s4201_s13 = scalar_select %p3434_p5, 1, 0 }
   0xf   : > { %s4202_s14 = scalar_select %p3438_p6, 1, 0 }
  0x10   : > { %p4195_p9 = scmp.eq.s32.totalorder %s3417_s25, 0  ;;  %p3445_p10 = pnand %p2730_p7, %p315_p8 }
  0x11   : > { %s3316_s16 = smov [#allocation3]   ;;  %s3317_s18 = smov [#allocation6]  }
  0x12   : > { %s4203_s15 = scalar_select %p3445_p10, 1, 0 }
  0x13   : > { %s328_s17 = sshll.u32 %s3316_s16, 4  ;;  %p3040_p11 = pneg %p3445_p10  ;;  %s329_s17 = int_to_ptr.vmem [resolvable:$true] %s328_s17 }
  0x14   : > { %s353_s19 = sshll.u32 %s3317_s18, 4  ;;  %s3205_s26 = scalar_lea.vmem %s329_s17, 48  ;;  %s354_s19 = int_to_ptr.vmem [resolvable:$true] %s353_s19 }
  0x15   : > { %p3453_p12 = pnand %p4195_p9, %p3040_p11  ;;  %p3206_p0 = scmp.ne.s32.totalorder %s329_s17, %s3205_s26 }
  0x16   : > { %s3212_s28 = scalar_lea.vmem %s329_s17, 64  ;;  %p3213_p3 = scmp.lt.s32.totalorder %s329_s17, %s329_s17 }
  0x17   : > { %p3196_p13 = pneg %p3453_p12  ;;  %p3214_p4 = scmp.lt.s32.totalorder %s3212_s28, %s3205_s26 }
  0x19   : > { %p3208_p1 = pnand %p3206_p0, %p3196_p13  ;;  %p3215_p7 = por %p3214_p4, %p3213_p3 }
  0x1b   : > { %p3209_p2 = pneg %p3208_p1 }
  0x1d   : > { %p3216_p8 = pnand %p3215_p7, %p3209_p2 }
  0x1f   : > { %3219 = shalt.err (!%p3216_p8)
}
  0x20   : > { %3043 = dma.hbm_to_vmem [thread:$0]  (!%p3453_p12), %s4183_s1, 48, %s329_s17, [#allocation4]  }
  0x21   : > { %s3231_s18 = scalar_lea.vmem %s354_s19, 32  ;;  %p3239_p1 = scmp.lt.s32.totalorder %s354_s19, %s354_s19 }
  0x22   : > { %p3232_p11 = scmp.ne.s32.totalorder %s354_s19, %s3231_s18  ;;  %p3240_p6 = scmp.lt.s32.totalorder %s3231_s18, %s3231_s18 }
  0x24   : > { %p3234_p9 = pnand %p3232_p11, %p3196_p13  ;;  %p3241_p5 = por %p3240_p6, %p3239_p1 }
  0x26   : > { %p3235_p0 = pneg %p3234_p9 }
  0x28   : > { %p3242_p10 = pnand %p3241_p5, %p3235_p0 }
  0x2a   : > { %3245 = shalt.err (!%p3242_p10)
}
  0x2b   : > { %s3318_s26 = smov 16   ;;  %s3319_s28 = smov 1  }
  0x2c   : > { %3046 = dma.hbm_to_vmem [thread:$0]  (!%p3453_p12), %s4189_s7, 32, %s354_s19, [#allocation7], %s3318_s26, %s3318_s26, %s3319_s28  }
  0x2d   : > { %p4205_p2 = scmp.ne.s32.totalorder %s4203_s15, 0 }
  0x2e   : > { %p4206_p3 = scmp.eq.s32.totalorder (!%p4205_p2), %s3417_s25, 0 }
  0x2f   : > { %389 = sbr.rel (%p4205_p2) target bundleno = 4088 (0xff8), region = 68 }
  0x34   : > { %3289 = dma.done.wait (%p4206_p3), [#allocation4], 48   ;;  %p4207_p9 = pmov %p4206_p3 }
  0x35   : > { %p4208_p5 = pmov %p4206_p3 }
  0x36   : > { %3291 = vsyncadd (%p4207_p9), [#allocation4], 4294967248 }
  0x37   : > { %3293 = dma.done.wait (%p4208_p5), [#allocation7], 32   ;;  %p4209_p6 = pmov %p4206_p3 }
  0x38   : > { %p435_p10 = scmp.lt.s32.totalorder %s3417_s25, 1  ;;  %v455_v0 = vlaneseq  ;;  %v3320_v1 = vmov 0   ;;  %v441_v6 = vld [vmem:[#allocation3] sm:$0x7]  ;;  %s3321_s20 = smov 92   ;;  %v3324_v37 = vmov 0.0  }
  0x39   : > { %3295 = vsyncadd (%p4209_p6), [#allocation7], 4294967264  ;;  %443 = vst [vmem:[#allocation2 + $0x8] sm:$0xff] %v3320_v1  ;;  %686 = vmatprep.mubr.bf16.mxu0 %v3320_v1  ;;  %3103 = vset.pattern.permute.xlu0 %v3320_v1  ;;  %s3322_s29 = smov 110   ;;  %s3323_s16 = smov 18   ;;  %vm582_vm0 = vcmask 752640  }
  0x3a   : > { %444 = vst [vmem:[#allocation2 + $0x10] sm:$0xf] %v3320_v1  ;;  %446 = vst [vmem:[#allocation2 + $0x1c] sm:$0xff] %v3320_v1  ;;  %s436_s23 = scalar_select %p435_p10, %s3417_s25, 1  ;;  %v456_v2 = vshrl.u32 %v455_v0, 7  ;;  %3102 = vset.pattern.permute.xlu1 %v3320_v1  ;;  %2937 = vmatprep.subr.bf16.mxu1 %v3324_v37  ;;  %vm555_vm1 = vcmask 900096  }
  0x3b   : > { %447 = vst [vmem:[#allocation2 + $0x24] sm:$0xf] %v3320_v1  ;;  %442 = vst [vmem:[#allocation2] sm:$0xff] %v3320_v1  ;;  %vm3325_vm2 = vmmov 0   ;;  %v507_v50 = vld [vmem:[%s4185_s3 + $0x8] sm:$0xff]  ;;  %v506_v51 = vld [vmem:[%s4185_s3] sm:$0xff] }
  0x3c   : > { %445 = vst [vmem:[#allocation2 + $0x14] sm:$0xff] %v3320_v1  ;;  %s3028_s30 = smul.u32 48, %s436_s23  ;;  %v465_v3 = vsub.s32 2, %v456_v2  ;;  %v3496_v4 = vsub.s32 0, %v456_v2  ;;  %v461_v5 = vsub.s32 1, %v456_v2  ;;  %2943 = vmatprep.mubr.msk.bf16.mxu1 %vm3325_vm2, %v3324_v37  ;;  %vm625_vm3 = vcmask 146432  }
  0x3d   : > { %vm644_vm4 = vcmask 392192   ;;  %s3326_s28 = smov 1   ;;  %s3327_s23 = smov 127   ;;  %vm794_vm5 = vcmask 7168   ;;  %vm831_vm6 = vcmask 1039360   ;;  %vm1291_vm7 = vcmask 31744  }
  0x3e   : > { %s439_s19 = scalar_lea.vmem %s4182_s0, %s3028_s30  ;;  %v3501_v9 = vrot.slane %v441_v6, %v465_v3  ;;  %v3504_v13 = vrot.slane %v441_v6, %v3496_v4  ;;  %v3506_v14 = vrot.slane %v441_v6, %v461_v5  ;;  %s3029_s30 = smul.u32 768, %s3417_s25 }
  0x3f   : > { %v450_v7 = vld [vmem:[%s439_s19 + $0x10] sm:$0xff]  ;;  %v453_v8 = vld [vmem:[%s439_s19 + $0x28] sm:$0xff]  ;;  %v448_v10 = vld [vmem:[%s439_s19] sm:$0xff]  ;;  %p4210_p13 = scmp.ne.s32.totalorder %s4201_s13, 0  ;;  %s3328_s26 = smov [#allocation8]  }
  0x40   : > { %v449_v11 = vld [vmem:[%s439_s19 + $0x8] sm:$0xff]  ;;  %v451_v12 = vld [vmem:[%s439_s19 + $0x18] sm:$0xff]  ;;  %v452_v15 = vld [vmem:[%s439_s19 + $0x20] sm:$0xff]  ;;  %v3509_v16 = vmul.f32 %v3501_v9, %v450_v7  ;;  %v3512_v17 = vmul.f32 %v3501_v9, %v453_v8  ;;  %v3515_v18 = vmul.f32 %v3504_v13, %v448_v10  ;;  %s4138_s17 = scalar_lea.hbm %s4194_s12, %s3029_s30 }
  0x41   : > { %v3518_v19 = vmul.f32 %v3506_v14, %v449_v11  ;;  %v3521_v20 = vmul.f32 %v3504_v13, %v451_v12  ;;  %v3524_v21 = vmul.f32 %v3506_v14, %v452_v15  ;;  %v3113_v10 = vld [vmem:[%s4184_s2] sm:$0xff]   ;;  %v3114_v15 = vld [vmem:[%s4184_s2 + $0x8] sm:$0xff]  }
  0x42   : > { %v2888_v22 = vpack.c.bf16 %v3509_v16, %v3509_v16  ;;  %v2890_v23 = vpack.c.bf16 %v3512_v17, %v3512_v17 }
  0x43   : > { %v2887_v24 = vpack.c.bf16 %v3518_v19, %v3515_v18  ;;  %v2889_v25 = vpack.c.bf16 %v3524_v21, %v3521_v20  ;;  %v3184_v26 = vpack.c.bf16 %v3521_v20, %v3515_v18  ;;  %v3185_v27 = vpack.c.bf16 %v3524_v21, %v3518_v19  ;;  %v3109_v46 = vld [vmem:[#allocation2] ss:$20 sps:$4 sm:$0xff]  }
  0x44   : > { %497 = vst [vmem:[#allocation2 + $0xc] sm:$0xf] %v2888_v22  ;;  %499 = vst [vmem:[#allocation2 + $0x20] sm:$0xf] %v2890_v23  ;;  %v3115_v22 = vld [vmem:[%s4184_s2 + $0x10] sm:$0xff]  }
  0x45   : > { %496 = vst [vmem:[#allocation2 + $0x4] sm:$0xff] %v2887_v24  ;;  %498 = vst [vmem:[#allocation2 + $0x18] sm:$0xff] %v2889_v25  ;;  %574 = vrot.lane.b32.xlu0 %v3184_v26, %s3321_s20 }
  0x49   : > { %576 = vrot.lane.b32.xlu0 %v3185_v27, %s3321_s20 }
  0x4b   : > { %v517_v28 = vld [vmem:[#allocation2 + $0xc] sm:$0xff]  ;;  %v519_v29 = vld [vmem:[#allocation2 + $0x20] sm:$0xff] }
  0x4c   : > { %v3104_v30 = vld [vmem:[#allocation2 + $0xc] ss:$20 sps:$4 sm:$0xff]   ;;  %v2752_v31 = vcombine.high %v517_v28, %v519_v29  ;;  %v3107_v44 = vld [vmem:[#allocation2 + $0x4] ss:$20 sps:$4 sm:$0xff]   ;;  %v3110_v48 = vld [vmem:[#allocation2 + $0x8] ss:$20 sps:$4 sm:$0xff]  }
  0x4d   : > { %578 = vrot.lane.b32.xlu1 %v3104_v30, %s3321_s20  ;;  %549 = vrot.lane.b32.xlu0 %v3184_v26, %s3322_s29  ;;  %v3106_v32 = vld [vmem:[#allocation2 + $0xc] ss:$20 sps:$4 sm:$0xff]  }
  0x4e   : > { %v3112_v49 = vld [vmem:[#allocation2 + $0xc] ss:$20 sps:$4 sm:$0xff]  }
  0x51   : > { %580 = vrot.lane.b32.xlu1 %v2752_v31, %s3321_s20  ;;  %553 = vrot.lane.b32.xlu0 %v3106_v32, %s3322_s29 }
  0x55   : > { %551 = vrot.lane.b32.xlu1 %v3185_v27, %s3322_s29 }
  0xb7   : > { %v575_v33 = vpop.permute.xlu0 %574 }
  0xb8   : > { %617 = vrot.lane.b32.xlu1 %v575_v33, %s3323_s16 }
  0xbb   : > { %v577_v34 = vpop.permute.xlu0 %576 }
  0xbc   : > { %v583_v40 = vsel %vm582_vm0, %v575_v33, %v577_v34 }
  0xbf   : > { %v579_v35 = vpop.permute.xlu1 %578  ;;  %v550_v36 = vpop.permute.xlu0 %549 }
  0xc0   : > { %609 = vrot.lane.b32.xlu1 %v550_v36, %s3323_s16  ;;  %v584_v43 = vsel %vm582_vm0, %v577_v34, %v579_v35 }
  0xc3   : > { %v581_v38 = vpop.permute.xlu1 %580  ;;  %v554_v39 = vpop.permute.xlu0 %553 }
  0xc4   : > { %619 = vrot.lane.b32.xlu1 %v583_v40, %s3323_s16  ;;  %615 = vrot.lane.b32.xlu0 %v554_v39, %s3323_s16  ;;  %v585_v45 = vsel %vm582_vm0, %v579_v35, %v581_v38 }
  0xc7   : > { %v552_v41 = vpop.permute.xlu1 %551 }
  0xc8   : > { %v556_v42 = vsel %vm555_vm1, %v550_v36, %v552_v41  ;;  %621 = vrot.lane.b32.xlu0 %v584_v43, %s3323_s16  ;;  %v557_v47 = vsel %vm555_vm1, %v552_v41, %v554_v39 }
  0xc9   : > { %611 = vrot.lane.b32.xlu1 %v556_v42, %s3323_s16 }
  0xcc   : > { %623 = vrot.lane.b32.xlu0 %v585_v45, %s3323_s16 }
  0xcd   : > { %603 = vrot.lane.b32.xlu1 %v3107_v44, %s3323_s16 }
  0xd0   : > { %613 = vrot.lane.b32.xlu0 %v557_v47, %s3323_s16 }
  0xd1   : > { %601 = vrot.lane.b32.xlu1 %v3109_v46, %s3323_s16 }
  0xd4   : > { %605 = vrot.lane.b32.xlu0 %v3110_v48, %s3323_s16 }
  0xd5   : > { %854 = vperm.xlu1 %3102, %v506_v51  }
  0xd8   : > { %607 = vrot.lane.b32.xlu0 %v3112_v49, %s3323_s16 }
  0xdc   : > { %859 = vperm.xlu0 %3103, %v507_v50  }
 0x12a   : > { %v618_v52 = vpop.permute.xlu1 %617 }
 0x132   : > { %v610_v53 = vpop.permute.xlu1 %609 }
 0x136   : > { %v620_v54 = vpop.permute.xlu1 %619  ;;  %v616_v55 = vpop.permute.xlu0 %615 }
 0x137   : > { %v632_v59 = vsel %vm625_vm3, %v618_v52, %v620_v54 }
 0x13a   : > { %v622_v57 = vpop.permute.xlu0 %621 }
 0x13b   : > { %v612_v56 = vpop.permute.xlu1 %611  ;;  %v633_v58 = vsel %vm625_vm3, %v620_v54, %v622_v57 }
 0x13c   : > { %664 = vmatprep.subr.bf16.mxu0 %v633_v58  ;;  %v629_v3 = vsel %vm625_vm3, %v610_v53, %v612_v56 }
 0x13d   : > { %665 = vmatpush1.bf16.msra.mxu0 %v632_v59 }
 0x13e   : > { %v624_v60 = vpop.permute.xlu0 %623 }
 0x13f   : > { %v604_v61 = vpop.permute.xlu1 %603  ;;  %v634_v62 = vsel %vm625_vm3, %v622_v57, %v624_v60 }
 0x140   : > { %2938 = vmatpush3.bf16.msra.mxu1 %v634_v62 }
 0x141   : > { %2939 = vmatprep.subr.bf16.mxu1 %v3324_v37 }
 0x142   : > { %v614_v63 = vpop.permute.xlu0 %613 }
 0x143   : > { %v630_v0 = vsel %vm625_vm3, %v612_v56, %v614_v63  ;;  %v631_v2 = vsel %vm625_vm3, %v614_v63, %v616_v55  ;;  %v602_v5 = vpop.permute.xlu1 %601 }
 0x144   : > { %666 = vmatprep.subr.bf16.mxu0 %v630_v0  ;;  %2940 = vmatpush3.bf16.msra.mxu1 %v631_v2  ;;  %v626_v8 = vsel %vm625_vm3, %v602_v5, %v604_v61 }
 0x145   : > { %667 = vmatpush1.bf16.msra.mxu0 %v629_v3  ;;  %2941 = vmatprep.subr.bf16.mxu1 %v3324_v37 }
 0x146   : > { %v606_v6 = vpop.permute.xlu0 %605 }
 0x147   : > { %v627_v7 = vsel %vm625_vm3, %v604_v61, %v606_v6 }
 0x148   : > { %668 = vmatprep.subr.bf16.mxu0 %v627_v7 }
 0x149   : > { %669 = vmatpush1.bf16.msra.mxu0 %v626_v8 }
 0x14a   : > { %v608_v11 = vpop.permute.xlu0 %607 }
 0x14b   : > { %v628_v12 = vsel %vm625_vm3, %v606_v6, %v608_v11 }
 0x14c   : > { %2756 = vmatmul.mubr.msk.bf16.vlgmr.msra.gmra.mxu0 %vm644_vm4, %v3113_v10  ;;  %2942 = vmatpush3.bf16.msra.mxu1 %v628_v12 }
 0x14d   : > { %696 = vmatprep.mubr.bf16.mxu0 %v3320_v1  ;;  %2955 = vmatprep.subr.bf16.mxu1 %v3324_v37 }
 0x14f   : > { %2944 = vmatmul.mubr.msk.bf16.vlgmr.msra.gmra.mxu1 %vm644_vm4, %v3113_v10 }
 0x150   : > { %2947 = vmatprep.mubr.msk.bf16.mxu1 %vm3325_vm2, %v3324_v37  ;;  %v855_v49 = vpop.permute.xlu1 %854 }
 0x154   : > { %2757 = vmatmul.mubr.msk.bf16.gmra.mxu0 %vm644_vm4, %v3114_v15 }
 0x155   : > { %706 = vmatprep.mubr.bf16.mxu0 %v3320_v1 }
 0x157   : > { %2948 = vmatmul.mubr.msk.bf16.gmra.mxu1 %vm644_vm4, %v3114_v15  ;;  %v860_v48 = vpop.permute.xlu0 %859 }
 0x158   : > { %2951 = vmatprep.mubr.msk.bf16.mxu1 %vm3325_vm2, %v3324_v37 }
 0x15c   : > { %2758 = vmatmul.mubr.msk.bf16.gmra.mxu0 %vm644_vm4, %v3115_v22 }
 0x15d   : > { %1086 = vmatprep.mubr.bf16.mxu0 %v3320_v1 }
 0x15f   : > { %2952 = vmatmul.mubr.msk.bf16.gmra.mxu1 %vm644_vm4, %v3115_v22 }
 0x160   : > { %2961 = vmatprep.mubr.msk.bf16.mxu1 %vm3325_vm2, %v3324_v37 }
 0x20c   : > { %v688_v23 = vpop.f32.mrf.mxu0 }
 0x20e   : > { %v690_v24 = vpop.f32.mrf.mxu0 }
 0x20f   : > { %v751_v25 = vpop.f32.mrf.mxu1  ;;  %788 = vrot.lane.b32.xlu0 %v690_v24, %s3326_s28 }
 0x210   : > { %776 = vrot.lane.b32.xlu1 %v751_v25, %s3326_s28  ;;  %v692_v26 = vpop.f32.mrf.mxu0 }
 0x211   : > { %v2945_v27 = vpop.f32.mrf.mxu1 }
 0x212   : > { %v694_v28 = vpop.f32.mrf.mxu0 }
 0x213   : > { %v754_v29 = vpop.f32.mrf.mxu1 }
 0x214   : > { %786 = vrot.lane.b32.xlu1 %v688_v23, %s3326_s28  ;;  %778 = vrot.lane.b32.xlu0 %v754_v29, %s3326_s28  ;;  %v698_v30 = vpop.f32.mrf.mxu0 }
 0x215   : > { %v2946_v31 = vpop.f32.mrf.mxu1 }
 0x216   : > { %v700_v32 = vpop.f32.mrf.mxu0 }
 0x217   : > { %v759_v33 = vpop.f32.mrf.mxu1 }
 0x218   : > { %790 = vrot.lane.b32.xlu1 %v692_v26, %s3326_s28  ;;  %792 = vrot.lane.b32.xlu0 %v694_v28, %s3326_s28  ;;  %v702_v34 = vpop.f32.mrf.mxu0 }
 0x219   : > { %v2949_v35 = vpop.f32.mrf.mxu1 }
 0x21a   : > { %v704_v36 = vpop.f32.mrf.mxu0 }
 0x21b   : > { %v762_v38 = vpop.f32.mrf.mxu1 }
 0x21c   : > { %v708_v39 = vpop.f32.mrf.mxu0 }
 0x21d   : > { %v2950_v40 = vpop.f32.mrf.mxu1  ;;  %819 = vrot.lane.b32.xlu1 %v708_v39, %s3327_s23 }
 0x21e   : > { %v710_v41 = vpop.f32.mrf.mxu0 }
 0x21f   : > { %v767_v42 = vpop.f32.mrf.mxu1 }
 0x220   : > { %823 = vrot.lane.b32.xlu0 %v767_v42, %s3327_s23  ;;  %v712_v43 = vpop.f32.mrf.mxu0 }
 0x221   : > { %v2953_v44 = vpop.f32.mrf.mxu1  ;;  %821 = vrot.lane.b32.xlu1 %v710_v41, %s3327_s23 }
 0x222   : > { %v714_v45 = vpop.f32.mrf.mxu0 }
 0x223   : > { %v770_v46 = vpop.f32.mrf.mxu1 }
 0x224   : > { %827 = vrot.lane.b32.xlu0 %v714_v45, %s3327_s23 }
 0x225   : > { %v2954_v47 = vpop.f32.mrf.mxu1  ;;  %825 = vrot.lane.b32.xlu1 %v712_v43, %s3327_s23 }
 0x229   : > { %829 = vrot.lane.b32.xlu1 %v770_v46, %s3327_s23 }
 0x281   : > { %v789_v50 = vpop.permute.xlu0 %788 }
 0x282   : > { %v777_v51 = vpop.permute.xlu1 %776 }
 0x283   : > { %v796_v56 = vsel %vm794_vm5, %v789_v50, %v777_v51 }
 0x284   : > { %v809_v60 = vadd.f32 %v796_v56, %v759_v33 }
 0x286   : > { %v787_v52 = vpop.permute.xlu1 %786  ;;  %v779_v53 = vpop.permute.xlu0 %778 }
 0x287   : > { %v795_v58 = vsel %vm794_vm5, %v787_v52, %v789_v50  ;;  %v805_v59 = vsel %vm794_vm5, %v777_v51, %v787_v52 }
 0x288   : > { %v807_v62 = vadd.f32 %v805_v59, %v698_v30  ;;  %v808_v63 = vadd.f32 %v795_v58, %v700_v32 }
 0x28a   : > { %v791_v54 = vpop.permute.xlu1 %790  ;;  %v793_v55 = vpop.permute.xlu0 %792 }
 0x28b   : > { %v806_v3 = vsel %vm794_vm5, %v779_v53, %v791_v54  ;;  %v798_v15 = vsel %vm794_vm5, %v793_v55, %v779_v53  ;;  %v797_v26 = vsel %vm794_vm5, %v791_v54, %v793_v55 }
 0x28c   : > { %v810_v22 = vadd.f32 %v806_v3, %v702_v34  ;;  %v812_v32 = vadd.f32 %v798_v15, %v762_v38  ;;  %v811_v35 = vadd.f32 %v797_v26, %v704_v36 }
 0x28f   : > { %v820_v57 = vpop.permute.xlu1 %819 }
 0x292   : > { %v824_v61 = vpop.permute.xlu0 %823 }
 0x293   : > { %v844_v0 = vsel %vm831_vm6, %v824_v61, %v820_v57  ;;  %v822_v2 = vpop.permute.xlu1 %821 }
 0x294   : > { %v848_v5 = vadd.f32 %v844_v0, %v809_v60  ;;  %v832_v6 = vsel %vm831_vm6, %v820_v57, %v822_v2  ;;  %v833_v7 = vsel %vm831_vm6, %v822_v2, %v824_v61  ;;  %v3116_v57 = vld [vmem:[#allocation2 + $0x10] ss:$20 sps:$4 sm:$0xff]  }
 0x295   : > { %v846_v8 = vadd.f32 %v832_v6, %v807_v62  ;;  %v847_v10 = vadd.f32 %v833_v7, %v808_v63  ;;  %983 = vrot.lane.b32.xlu1 %v3116_v57, %s3321_s20 }
 0x296   : > { %v864_v11 = vadd.f32 %v855_v49, %v848_v5  ;;  %v828_v12 = vpop.permute.xlu0 %827 }
 0x297   : > { %v862_v23 = vadd.f32 %v855_v49, %v846_v8  ;;  %v863_v24 = vadd.f32 %v855_v49, %v847_v10  ;;  %v826_v25 = vpop.permute.xlu1 %825 }
 0x298   : > { %v870_v27 = vmax.f32 %v864_v11, 0.0  ;;  %v834_v28 = vsel %vm831_vm6, %v826_v25, %v828_v12 }
 0x299   : > { %v868_v29 = vmax.f32 %v862_v23, 0.0  ;;  %v869_v30 = vmax.f32 %v863_v24, 0.0  ;;  %v849_v31 = vadd.f32 %v834_v28, %v810_v22  ;;  %v910_v22 = vld [vmem:[%s4187_s5] sm:$0xff] }
 0x29a   : > { %v876_v33 = vmul.f32 %v870_v27, %v3501_v9 }
 0x29b   : > { %v874_v39 = vmul.f32 %v868_v29, %v3504_v13  ;;  %v875_v40 = vmul.f32 %v869_v30, %v3506_v14  ;;  %v865_v34 = vadd.f32 %v860_v48, %v849_v31  ;;  %v830_v41 = vpop.permute.xlu1 %829 }
 0x29c   : > { %v2892_v42 = vpack.c.bf16 %v876_v33, %v876_v33  ;;  %v835_v43 = vsel %vm831_vm6, %v828_v12, %v830_v41  ;;  %v845_v44 = vsel %vm831_vm6, %v830_v41, %v826_v25  ;;  %v3122_v12 = vld [vmem:[#allocation2] ss:$20 sps:$4 sm:$0xff]   ;;  %v911_v25 = vld [vmem:[%s4187_s5 + $0x8] sm:$0xff] }
 0x29d   : > { %v2891_v45 = vpack.c.bf16 %v875_v40, %v874_v39  ;;  %v850_v46 = vadd.f32 %v835_v43, %v811_v35  ;;  %v851_v47 = vadd.f32 %v845_v44, %v812_v32  ;;  %v871_v38 = vmax.f32 %v865_v34, 0.0 }
 0x29e   : > { %901 = vst [vmem:[#allocation2 + $0xc] sm:$0xf] %v2892_v42 }
 0x29f   : > { %900 = vst [vmem:[#allocation2 + $0x4] sm:$0xff] %v2891_v45  ;;  %v866_v49 = vadd.f32 %v860_v48, %v850_v46  ;;  %v867_v50 = vadd.f32 %v860_v48, %v851_v47  ;;  %v877_v52 = vmul.f32 %v871_v38, %v3504_v13  ;;  %v3126_v38 = vld [vmem:[%s4186_s4] sm:$0xff]  }
 0x2a1   : > { %v872_v36 = vmax.f32 %v866_v49, 0.0  ;;  %v873_v51 = vmax.f32 %v867_v50, 0.0  ;;  %v3187_v48 = vpack.c.bf16 %v877_v52, %v874_v39 }
 0x2a3   : > { %v878_v53 = vmul.f32 %v872_v36, %v3506_v14  ;;  %v879_v54 = vmul.f32 %v873_v51, %v3501_v9  ;;  %v3127_v36 = vld [vmem:[%s4186_s4 + $0x8] sm:$0xff]   ;;  %v3128_v51 = vld [vmem:[%s4186_s4 + $0x10] sm:$0xff]  }
 0x2a5   : > { %v2893_v55 = vpack.c.bf16 %v878_v53, %v877_v52  ;;  %v2894_v56 = vpack.c.bf16 %v879_v54, %v879_v54  ;;  %v3186_v59 = vpack.c.bf16 %v878_v53, %v875_v40 }
 0x2a7   : > { %902 = vst [vmem:[#allocation2 + $0x18] sm:$0xff] %v2893_v55  ;;  %903 = vst [vmem:[#allocation2 + $0x20] sm:$0xf] %v2894_v56  ;;  %979 = vrot.lane.b32.xlu1 %v3186_v59, %s3321_s20 }
 0x2ab   : > { %955 = vrot.lane.b32.xlu1 %v3186_v59, %s3322_s29 }
 0x2ae   : > { %v3118_v58 = vld [vmem:[#allocation2 + $0xc] ss:$20 sps:$4 sm:$0xff]   ;;  %v3120_v10 = vld [vmem:[#allocation2 + $0x4] ss:$20 sps:$4 sm:$0xff]   ;;  %v3123_v23 = vld [vmem:[#allocation2 + $0x8] ss:$20 sps:$4 sm:$0xff]  }
 0x2af   : > { %981 = vrot.lane.b32.xlu0 %v3118_v58, %s3321_s20  ;;  %v3119_v60 = vld [vmem:[#allocation2 + $0xc] ss:$20 sps:$4 sm:$0xff]  }
 0x2b0   : > { %v3125_v24 = vld [vmem:[#allocation2 + $0xc] ss:$20 sps:$4 sm:$0xff]  }
 0x2b3   : > { %977 = vrot.lane.b32.xlu0 %v3187_v48, %s3321_s20 }
 0x2b7   : > { %953 = vrot.lane.b32.xlu0 %v3187_v48, %s3322_s29 }
 0x2bb   : > { %957 = vrot.lane.b32.xlu0 %v3119_v60, %s3322_s29 }
 0x307   : > { %v984_v62 = vpop.permute.xlu1 %983 }
 0x319   : > { %v980_v0 = vpop.permute.xlu1 %979 }
 0x31d   : > { %v956_v6 = vpop.permute.xlu1 %955 }
 0x321   : > { %v982_v61 = vpop.permute.xlu0 %981 }
 0x322   : > { %v987_v8 = vsel %vm582_vm0, %v982_v61, %v984_v62  ;;  %v986_v11 = vsel %vm582_vm0, %v980_v0, %v982_v61 }
 0x325   : > { %v978_v63 = vpop.permute.xlu0 %977 }
 0x326   : > { %1019 = vrot.lane.b32.xlu1 %v978_v63, %s3323_s16  ;;  %v985_v5 = vsel %vm582_vm0, %v978_v63, %v980_v0 }
 0x329   : > { %v954_v2 = vpop.permute.xlu0 %953 }
 0x32a   : > { %1011 = vrot.lane.b32.xlu1 %v954_v2, %s3323_s16  ;;  %v959_v7 = vsel %vm555_vm1, %v954_v2, %v956_v6 }
 0x32d   : > { %v958_v3 = vpop.permute.xlu0 %957 }
 0x32e   : > { %1021 = vrot.lane.b32.xlu1 %v985_v5, %s3323_s16  ;;  %1017 = vrot.lane.b32.xlu0 %v958_v3, %s3323_s16  ;;  %v960_v15 = vsel %vm555_vm1, %v956_v6, %v958_v3 }
 0x332   : > { %1013 = vrot.lane.b32.xlu1 %v959_v7, %s3323_s16  ;;  %1025 = vrot.lane.b32.xlu0 %v987_v8, %s3323_s16 }
 0x336   : > { %1023 = vrot.lane.b32.xlu0 %v986_v11, %s3323_s16  ;;  %1005 = vrot.lane.b32.xlu1 %v3120_v10, %s3323_s16 }
 0x33a   : > { %1015 = vrot.lane.b32.xlu0 %v960_v15, %s3323_s16  ;;  %1003 = vrot.lane.b32.xlu1 %v3122_v12, %s3323_s16 }
 0x33e   : > { %1007 = vrot.lane.b32.xlu0 %v3123_v23, %s3323_s16  ;;  %1252 = vperm.xlu1 %3102, %v910_v22  }
 0x342   : > { %1009 = vrot.lane.b32.xlu0 %v3125_v24, %s3323_s16 }
 0x346   : > { %1257 = vperm.xlu0 %3103, %v911_v25  }
 0x398   : > { %v1020_v26 = vpop.permute.xlu1 %1019 }
 0x39c   : > { %v1012_v27 = vpop.permute.xlu1 %1011 }
 0x3a0   : > { %v1022_v28 = vpop.permute.xlu1 %1021  ;;  %v1018_v29 = vpop.permute.xlu0 %1017 }
 0x3a1   : > { %v1033_v40 = vsel %vm625_vm3, %v1020_v26, %v1022_v28 }
 0x3a4   : > { %v1014_v30 = vpop.permute.xlu1 %1013  ;;  %v1026_v31 = vpop.permute.xlu0 %1025 }
 0x3a5   : > { %v1030_v43 = vsel %vm625_vm3, %v1012_v27, %v1014_v30 }
 0x3a8   : > { %v1024_v32 = vpop.permute.xlu0 %1023  ;;  %v1006_v33 = vpop.permute.xlu1 %1005 }
 0x3a9   : > { %v1034_v35 = vsel %vm625_vm3, %v1022_v28, %v1024_v32  ;;  %v1035_v39 = vsel %vm625_vm3, %v1024_v32, %v1026_v31 }
 0x3aa   : > { %1064 = vmatprep.subr.bf16.mxu0 %v1034_v35  ;;  %2956 = vmatpush3.bf16.msra.mxu1 %v1035_v39 }
 0x3ab   : > { %1065 = vmatpush1.bf16.msra.mxu0 %v1033_v40  ;;  %2957 = vmatprep.subr.bf16.mxu1 %v3324_v37 }
 0x3ac   : > { %v1016_v34 = vpop.permute.xlu0 %1015  ;;  %v1004_v44 = vpop.permute.xlu1 %1003 }
 0x3ad   : > { %v1031_v41 = vsel %vm625_vm3, %v1014_v30, %v1016_v34  ;;  %v1032_v42 = vsel %vm625_vm3, %v1016_v34, %v1018_v29  ;;  %v1027_v47 = vsel %vm625_vm3, %v1004_v44, %v1006_v33 }
 0x3ae   : > { %1066 = vmatprep.subr.bf16.mxu0 %v1031_v41  ;;  %2958 = vmatpush3.bf16.msra.mxu1 %v1032_v42 }
 0x3af   : > { %1067 = vmatpush1.bf16.msra.mxu0 %v1030_v43  ;;  %2959 = vmatprep.subr.bf16.mxu1 %v3324_v37 }
 0x3b0   : > { %v1008_v45 = vpop.permute.xlu0 %1007 }
 0x3b1   : > { %v1028_v46 = vsel %vm625_vm3, %v1006_v33, %v1008_v45 }
 0x3b2   : > { %1068 = vmatprep.subr.bf16.mxu0 %v1028_v46 }
 0x3b3   : > { %1069 = vmatpush1.bf16.msra.mxu0 %v1027_v47 }
 0x3b4   : > { %v1010_v49 = vpop.permute.xlu0 %1009 }
 0x3b5   : > { %v1029_v50 = vsel %vm625_vm3, %v1008_v45, %v1010_v49 }
 0x3b6   : > { %2780 = vmatmul.mubr.msk.bf16.vlgmr.msra.gmra.mxu0 %vm644_vm4, %v3126_v38  ;;  %2960 = vmatpush3.bf16.msra.mxu1 %v1029_v50 }
 0x3b7   : > { %1096 = vmatprep.mubr.bf16.mxu0 %v3320_v1  ;;  %2973 = vmatprep.subr.bf16.mxu1 %v3324_v37 }
 0x3b9   : > { %2962 = vmatmul.mubr.msk.bf16.vlgmr.msra.gmra.mxu1 %vm644_vm4, %v3126_v38  ;;  %v1253_v23 = vpop.permute.xlu1 %1252 }
 0x3ba   : > { %2965 = vmatprep.mubr.msk.bf16.mxu1 %vm3325_vm2, %v3324_v37 }
 0x3be   : > { %2781 = vmatmul.mubr.msk.bf16.gmra.mxu0 %vm644_vm4, %v3127_v36 }
 0x3bf   : > { %1106 = vmatprep.mubr.bf16.mxu0 %v3320_v1 }
 0x3c1   : > { %2966 = vmatmul.mubr.msk.bf16.gmra.mxu1 %vm644_vm4, %v3127_v36  ;;  %v1258_v22 = vpop.permute.xlu0 %1257 }
 0x3c2   : > { %2969 = vmatprep.mubr.msk.bf16.mxu1 %vm3325_vm2, %v3324_v37 }
 0x3c6   : > { %2782 = vmatmul.mubr.msk.bf16.gmra.mxu0 %vm644_vm4, %v3128_v51 }
 0x3c7   : > { %1559 = vmatprep.mubr.bf16.mxu0 %v3320_v1 }
 0x3c9   : > { %2970 = vmatmul.mubr.msk.bf16.gmra.mxu1 %vm644_vm4, %v3128_v51 }
 0x3ca   : > { %2979 = vmatprep.mubr.msk.bf16.mxu1 %vm3325_vm2, %v3324_v37 }
 0x476   : > { %v1088_v52 = vpop.f32.mrf.mxu0 }
 0x478   : > { %v1090_v53 = vpop.f32.mrf.mxu0 }
 0x479   : > { %v1151_v54 = vpop.f32.mrf.mxu1  ;;  %1188 = vrot.lane.b32.xlu0 %v1090_v53, %s3326_s28 }
 0x47a   : > { %1176 = vrot.lane.b32.xlu1 %v1151_v54, %s3326_s28  ;;  %v1092_v55 = vpop.f32.mrf.mxu0 }
 0x47b   : > { %v2963_v56 = vpop.f32.mrf.mxu1 }
 0x47c   : > { %v1094_v57 = vpop.f32.mrf.mxu0 }
 0x47d   : > { %v1154_v58 = vpop.f32.mrf.mxu1 }
 0x47e   : > { %1186 = vrot.lane.b32.xlu1 %v1088_v52, %s3326_s28  ;;  %1178 = vrot.lane.b32.xlu0 %v1154_v58, %s3326_s28  ;;  %v1098_v59 = vpop.f32.mrf.mxu0 }
 0x47f   : > { %v2964_v48 = vpop.f32.mrf.mxu1 }
 0x480   : > { %v1100_v60 = vpop.f32.mrf.mxu0 }
 0x481   : > { %v1159_v61 = vpop.f32.mrf.mxu1 }
 0x482   : > { %1190 = vrot.lane.b32.xlu1 %v1092_v55, %s3326_s28  ;;  %1192 = vrot.lane.b32.xlu0 %v1094_v57, %s3326_s28  ;;  %v1102_v62 = vpop.f32.mrf.mxu0 }
 0x483   : > { %v2967_v63 = vpop.f32.mrf.mxu1 }
 0x484   : > { %v1104_v0 = vpop.f32.mrf.mxu0 }
 0x485   : > { %v1162_v2 = vpop.f32.mrf.mxu1 }
 0x486   : > { %v1108_v3 = vpop.f32.mrf.mxu0 }
 0x487   : > { %v2968_v5 = vpop.f32.mrf.mxu1 }
 0x488   : > { %v1110_v6 = vpop.f32.mrf.mxu0 }
 0x489   : > { %v1167_v7 = vpop.f32.mrf.mxu1  ;;  %1220 = vrot.lane.b32.xlu0 %v1110_v6, %s3327_s23 }
 0x48a   : > { %1222 = vrot.lane.b32.xlu1 %v1167_v7, %s3327_s23  ;;  %v1112_v10 = vpop.f32.mrf.mxu0 }
 0x48b   : > { %v2971_v8 = vpop.f32.mrf.mxu1 }
 0x48c   : > { %v1114_v15 = vpop.f32.mrf.mxu0 }
 0x48d   : > { %v1170_v11 = vpop.f32.mrf.mxu1  ;;  %1224 = vrot.lane.b32.xlu0 %v1112_v10, %s3327_s23 }
 0x48e   : > { %1218 = vrot.lane.b32.xlu1 %v1108_v3, %s3327_s23 }
 0x48f   : > { %v2972_v12 = vpop.f32.mrf.mxu1 }
 0x491   : > { %1228 = vrot.lane.b32.xlu0 %v1170_v11, %s3327_s23 }
 0x492   : > { %1226 = vrot.lane.b32.xlu1 %v1114_v15, %s3327_s23 }
 0x4eb   : > { %v1189_v24 = vpop.permute.xlu0 %1188 }
 0x4ec   : > { %v1177_v25 = vpop.permute.xlu1 %1176 }
 0x4ed   : > { %v1195_v35 = vsel %vm794_vm5, %v1189_v24, %v1177_v25 }
 0x4ee   : > { %v1208_v42 = vadd.f32 %v1195_v35, %v1159_v61 }
 0x4f0   : > { %v1179_v26 = vpop.permute.xlu0 %1178  ;;  %v1187_v27 = vpop.permute.xlu1 %1186 }
 0x4f1   : > { %v1194_v30 = vsel %vm794_vm5, %v1187_v27, %v1189_v24  ;;  %v1204_v39 = vsel %vm794_vm5, %v1177_v25, %v1187_v27  ;;  %v1272_v27 = vld [vmem:[%s4188_s6] sm:$0xff] }
 0x4f2   : > { %v1207_v32 = vadd.f32 %v1194_v30, %v1100_v60  ;;  %v1206_v43 = vadd.f32 %v1204_v39, %v1098_v59 }
 0x4f4   : > { %v1193_v28 = vpop.permute.xlu0 %1192  ;;  %v1191_v29 = vpop.permute.xlu1 %1190 }
 0x4f5   : > { %v1197_v44 = vsel %vm794_vm5, %v1193_v28, %v1179_v26  ;;  %v1205_v45 = vsel %vm794_vm5, %v1179_v26, %v1191_v29  ;;  %v1196_v47 = vsel %vm794_vm5, %v1191_v29, %v1193_v28 }
 0x4f6   : > { %v1211_v52 = vadd.f32 %v1197_v44, %v1162_v2  ;;  %v1209_v53 = vadd.f32 %v1205_v45, %v1102_v62  ;;  %v1210_v55 = vadd.f32 %v1196_v47, %v1104_v0  ;;  %v1276_v47 = vld [vmem:[%s4190_s8 + $0x8] sm:$0xff] }
 0x4fb   : > { %v1221_v31 = vpop.permute.xlu0 %1220 }
 0x4fc   : > { %v1223_v33 = vpop.permute.xlu1 %1222 }
 0x4fd   : > { %v1231_v40 = vsel %vm831_vm6, %v1221_v31, %v1223_v33 }
 0x4fe   : > { %v1245_v34 = vadd.f32 %v1231_v40, %v1207_v32 }
 0x4ff   : > { %v1225_v41 = vpop.permute.xlu0 %1224 }
 0x500   : > { %v1219_v46 = vpop.permute.xlu1 %1218  ;;  %v1261_v50 = vadd.f32 %v1253_v23, %v1245_v34 }
 0x501   : > { %v1230_v38 = vsel %vm831_vm6, %v1219_v46, %v1221_v31  ;;  %v1242_v49 = vsel %vm831_vm6, %v1223_v33, %v1219_v46 }
 0x502   : > { %v1244_v36 = vadd.f32 %v1230_v38, %v1206_v43  ;;  %v1246_v51 = vadd.f32 %v1242_v49, %v1208_v42  ;;  %v3731_v2 = vmul.f32 %v1261_v50, %v3506_v14  ;;  %v1274_v43 = vld [vmem:[#allocation6] sm:$0x1]  ;;  %v1275_v38 = vld [vmem:[%s4190_s8] sm:$0xff] }
 0x503   : > { %v1229_v54 = vpop.permute.xlu0 %1228 }
 0x504   : > { %v1260_v56 = vadd.f32 %v1253_v23, %v1244_v36  ;;  %v1243_v57 = vsel %vm831_vm6, %v1229_v54, %v1225_v41  ;;  %v1227_v58 = vpop.permute.xlu1 %1226  ;;  %v1262_v59 = vadd.f32 %v1253_v23, %v1246_v51 }
 0x505   : > { %v1249_v48 = vadd.f32 %v1243_v57, %v1211_v52  ;;  %v1232_v60 = vsel %vm831_vm6, %v1225_v41, %v1227_v58  ;;  %v1233_v61 = vsel %vm831_vm6, %v1227_v58, %v1229_v54  ;;  %v1277_v54 = vld [vmem:[%s4191_s9] sm:$0xff] }
 0x506   : > { %v1247_v63 = vadd.f32 %v1232_v60, %v1209_v53  ;;  %v1248_v3 = vadd.f32 %v1233_v61, %v1210_v55  ;;  %v3728_v5 = vmul.f32 %v1260_v56, %v3504_v13  ;;  %v3734_v62 = vmul.f32 %v1262_v59, %v3501_v9  ;;  %v1278_v53 = vld [vmem:[%s4191_s9 + $0x8] sm:$0xff] }
 0x507   : > { %v1265_v8 = vadd.f32 %v1258_v22, %v1249_v48 }
 0x508   : > { %v1263_v0 = vadd.f32 %v1258_v22, %v1247_v63  ;;  %v1264_v6 = vadd.f32 %v1258_v22, %v1248_v3  ;;  %v1279_v7 = vadd.f32 %v3731_v2, %v3728_v5  ;;  %v1273_v22 = vld [vmem:[%s4188_s6 + $0x8] sm:$0xff] }
 0x509   : > { %v1271_v15 = vmul.f32 %v1265_v8, %v3501_v9 }
 0x50a   : > { %v1280_v10 = vadd.f32 %v1279_v7, %v3734_v62  ;;  %v1269_v11 = vmul.f32 %v1263_v0, %v3504_v13  ;;  %v1270_v12 = vmul.f32 %v1264_v6, %v3506_v14 }
 0x50c   : > { %1281 = vadd.xlane.f32.xlu1 %v1280_v10  ;;  %v1283_v23 = vadd.f32 %v1270_v12, %v1269_v11 }
 0x50e   : > { %v1284_v24 = vadd.f32 %v1283_v23, %v1271_v15 }
 0x510   : > { %1285 = vadd.xlane.f32.xlu0 %v1284_v24 }
 0x595   : > { %v1282_v25 = vpop.xlane.xlu1 %1281 }
 0x596   : > { %v1287_v26 = vmul.f32 0.00390625, %v1282_v25 }
 0x598   : > { %v1289_v29 = vmul.f32 %v1287_v26, %v1272_v27 }
 0x599   : > { %v1286_v28 = vpop.xlane.xlu0 %1285 }
 0x59a   : > { %v1288_v30 = vmul.f32 0.00390625, %v1286_v28  ;;  %v1292_v32 = vsel %vm1291_vm7, %v1289_v29, 0.0 }
 0x59c   : > { %v1290_v31 = vmul.f32 %v1288_v30, %v1273_v22 }
 0x59e   : > { %v1293_v33 = vsel %vm1291_vm7, %v1290_v31, 0.0 }
 0x59f   : > { %v1294_v35 = vadd.f32 %v1293_v33, %v1292_v32  ;;  %v3129_v33 = vld [vmem:[#allocation2 + $0x10] ss:$20 sps:$4 sm:$0xff]  }
 0x5a1   : > { %v1295_v39 = vrot.slane %v1294_v35, 4 }
 0x5a3   : > { %v1296_v40 = vadd.f32 %v1295_v39, %v1294_v35 }
 0x5a5   : > { %v1297_v34 = vrot.slane %v1296_v40, 2 }
 0x5a7   : > { %v1298_v41 = vadd.f32 %v1297_v34, %v1296_v40 }
 0x5a9   : > { %v1299_v42 = vrot.slane %v1298_v41, 1 }
 0x5ab   : > { %v1300_v44 = vadd.f32 %v1299_v42, %v1298_v41 }
 0x5ad   : > { %v1301_v45 = vadd.f32 %v1300_v44, %v1274_v43 }
 0x5af   : > { %v1302_v46 = vmax.f32 %v1301_v45, 0.0 }
 0x5b1   : > { %v1306_v49 = vrot.slane %v1302_v46, %v3496_v4 }
 0x5b3   : > { %v1308_v50 = vmul.f32 %v1306_v49, %v1276_v47  ;;  %v1307_v36 = vmul.f32 %v1306_v49, %v1275_v38 }
 0x5b5   : > { %v1312_v51 = vsel %vm1291_vm7, %v1308_v50, 0.0  ;;  %v1309_v52 = vsel %vm1291_vm7, %v1307_v36, 0.0  ;;  %v3135_v36 = vld [vmem:[#allocation2] ss:$20 sps:$4 sm:$0xff]  }
 0x5b6   : > { %1313 = vadd.xlane.f32.xlu1 %v1312_v51  ;;  %1310 = vadd.xlane.f32.xlu0 %v1309_v52  ;;  %v2798_v52 = vld [vmem:[%s4185_s3 + $0x10] sm:$0xff] }
 0x63f   : > { %v1314_v55 = vpop.xlane.xlu1 %1313  ;;  %v1311_v56 = vpop.xlane.xlu0 %1310 }
 0x640   : > { %v1316_v57 = vadd.f32 %v1314_v55, %v1278_v53  ;;  %v1315_v58 = vadd.f32 %v1311_v56, %v1277_v54  ;;  %v2799_v55 = vld [vmem:[%s4185_s3 + $0x18] sm:$0xff] }
 0x642   : > { %v2787_v59 = vmul.f32 -1.442695, %v1316_v57  ;;  %v2786_v48 = vmul.f32 -1.442695, %v1315_v58 }
 0x644   : > { %3168 = vpow2.f32 %v2787_v59 }
 0x645   : > { %3170 = vpow2.f32 %v2786_v48 }
 0x651   : > { %v3169_v60 = vpop.eup %3168 }
 0x652   : > { %v3171_v61 = vpop.eup %3170  ;;  %v1324_v63 = vadd.f32 1.0, %v3169_v60 }
 0x653   : > { %v1323_v3 = vadd.f32 1.0, %v3171_v61 }
 0x654   : > { %3172 = vrcp.f32 %v1324_v63 }
 0x655   : > { %3174 = vrcp.f32 %v1323_v3 }
 0x661   : > { %v3173_v0 = vpop.eup %3172 }
 0x662   : > { %v3175_v6 = vpop.eup %3174  ;;  %1336 = vperm.xlu1 %3102, %v3173_v0  }
 0x663   : > { %1331 = vperm.xlu0 %3103, %v3175_v6  }
 0x6dd   : > { %v1337_v7 = vpop.permute.xlu1 %1336 }
 0x6de   : > { %v1342_v8 = vmul.f32 %v1337_v7, %v1269_v11  ;;  %v1343_v10 = vmul.f32 %v1337_v7, %v1270_v12  ;;  %v1344_v23 = vmul.f32 %v1337_v7, %v1271_v15  ;;  %v1332_v24 = vpop.permute.xlu0 %1331 }
 0x6df   : > { %v1339_v25 = vmul.f32 %v1332_v24, %v3728_v5  ;;  %v1340_v26 = vmul.f32 %v1332_v24, %v3731_v2  ;;  %v1341_v27 = vmul.f32 %v1332_v24, %v3734_v62 }
 0x6e0   : > { %v3769_v22 = vadd.f32 %v1342_v8, %v3521_v20  ;;  %v3772_v28 = vadd.f32 %v1343_v10, %v3524_v21  ;;  %v3775_v29 = vadd.f32 %v1344_v23, %v3512_v17 }
 0x6e1   : > { %v3778_v11 = vadd.f32 %v1339_v25, %v3515_v18  ;;  %v3781_v12 = vadd.f32 %v1340_v26, %v3518_v19  ;;  %v3784_v5 = vadd.f32 %v1341_v27, %v3509_v16 }
 0x6e2   : > { %v2897_v2 = vpack.c.bf16 %v3772_v28, %v3769_v22  ;;  %v2898_v62 = vpack.c.bf16 %v3775_v29, %v3775_v29 }
 0x6e3   : > { %v2895_v15 = vpack.c.bf16 %v3781_v12, %v3778_v11  ;;  %v2896_v30 = vpack.c.bf16 %v3784_v5, %v3784_v5  ;;  %v3188_v31 = vpack.c.bf16 %v3772_v28, %v3781_v12  ;;  %v3189_v32 = vpack.c.bf16 %v3769_v22, %v3778_v11 }
 0x6e4   : > { %1373 = vst [vmem:[#allocation2 + $0x18] sm:$0xff] %v2897_v2  ;;  %1374 = vst [vmem:[#allocation2 + $0x20] sm:$0xf] %v2898_v62  ;;  %v3139_v2 = vld [vmem:[%s4184_s2 + $0x18] sm:$0xff]  }
 0x6e5   : > { %1371 = vst [vmem:[#allocation2 + $0x4] sm:$0xff] %v2895_v15  ;;  %1372 = vst [vmem:[#allocation2 + $0xc] sm:$0xf] %v2896_v30  ;;  %1452 = vrot.lane.b32.xlu0 %v3188_v31, %s3321_s20  ;;  %1450 = vrot.lane.b32.xlu1 %v3189_v32, %s3321_s20  ;;  %v3140_v30 = vld [vmem:[%s4184_s2 + $0x20] sm:$0xff]  }
 0x6e9   : > { %1456 = vrot.lane.b32.xlu0 %v3129_v33, %s3321_s20 }
 0x6ec   : > { %v3131_v35 = vld [vmem:[#allocation2 + $0xc] ss:$20 sps:$4 sm:$0xff]   ;;  %v3133_v49 = vld [vmem:[#allocation2 + $0x4] ss:$20 sps:$4 sm:$0xff]   ;;  %v3136_v53 = vld [vmem:[#allocation2 + $0x8] ss:$20 sps:$4 sm:$0xff]  }
 0x6ed   : > { %1454 = vrot.lane.b32.xlu1 %v3131_v35, %s3321_s20  ;;  %1428 = vrot.lane.b32.xlu0 %v3188_v31, %s3322_s29  ;;  %v3132_v39 = vld [vmem:[#allocation2 + $0xc] ss:$20 sps:$4 sm:$0xff]  }
 0x6ee   : > { %v3138_v54 = vld [vmem:[#allocation2 + $0xc] ss:$20 sps:$4 sm:$0xff]  }
 0x6ef   : > { %v3141_v31 = vld [vmem:[%s4184_s2 + $0x28] sm:$0xff]  }
 0x6f1   : > { %1426 = vrot.lane.b32.xlu1 %v3189_v32, %s3322_s29 }
 0x6f5   : > { %1430 = vrot.lane.b32.xlu1 %v3132_v39, %s3322_s29 }
 0x757   : > { %v1451_v40 = vpop.permute.xlu1 %1450  ;;  %v1453_v34 = vpop.permute.xlu0 %1452 }
 0x758   : > { %1492 = vrot.lane.b32.xlu0 %v1451_v40, %s3323_s16  ;;  %v1458_v45 = vsel %vm582_vm0, %v1451_v40, %v1453_v34 }
 0x75b   : > { %v1457_v42 = vpop.permute.xlu0 %1456 }
 0x75f   : > { %v1455_v41 = vpop.permute.xlu1 %1454  ;;  %v1429_v46 = vpop.permute.xlu0 %1428 }
 0x760   : > { %v1459_v38 = vsel %vm582_vm0, %v1453_v34, %v1455_v41  ;;  %v1460_v50 = vsel %vm582_vm0, %v1455_v41, %v1457_v42 }
 0x763   : > { %v1427_v43 = vpop.permute.xlu1 %1426 }
 0x764   : > { %1484 = vrot.lane.b32.xlu0 %v1427_v43, %s3323_s16  ;;  %v1432_v47 = vsel %vm555_vm1, %v1427_v43, %v1429_v46 }
 0x767   : > { %v1431_v44 = vpop.permute.xlu1 %1430 }
 0x768   : > { %1494 = vrot.lane.b32.xlu0 %v1458_v45, %s3323_s16  ;;  %1490 = vrot.lane.b32.xlu1 %v1431_v44, %s3323_s16  ;;  %v1433_v51 = vsel %vm555_vm1, %v1429_v46, %v1431_v44 }
 0x76c   : > { %1486 = vrot.lane.b32.xlu0 %v1432_v47, %s3323_s16  ;;  %1496 = vrot.lane.b32.xlu1 %v1459_v38, %s3323_s16 }
 0x770   : > { %1498 = vrot.lane.b32.xlu1 %v1460_v50, %s3323_s16  ;;  %1478 = vrot.lane.b32.xlu0 %v3133_v49, %s3323_s16 }
 0x774   : > { %1488 = vrot.lane.b32.xlu1 %v1433_v51, %s3323_s16  ;;  %1476 = vrot.lane.b32.xlu0 %v3135_v36, %s3323_s16 }
 0x778   : > { %1480 = vrot.lane.b32.xlu1 %v3136_v53, %s3323_s16  ;;  %1725 = vperm.xlu0 %3103, %v2798_v52  }
 0x77c   : > { %1482 = vrot.lane.b32.xlu1 %v3138_v54, %s3323_s16 }
 0x780   : > { %1730 = vperm.xlu1 %3102, %v2799_v55  }
 0x7ca   : > { %v1493_v56 = vpop.permute.xlu0 %1492 }
 0x7d6   : > { %v1485_v57 = vpop.permute.xlu0 %1484 }
 0x7da   : > { %v1495_v58 = vpop.permute.xlu0 %1494  ;;  %v1491_v59 = vpop.permute.xlu1 %1490 }
 0x7db   : > { %v1506_v63 = vsel %vm625_vm3, %v1493_v56, %v1495_v58 }
 0x7de   : > { %v1487_v48 = vpop.permute.xlu0 %1486  ;;  %v1497_v60 = vpop.permute.xlu1 %1496 }
 0x7df   : > { %v1507_v61 = vsel %vm625_vm3, %v1495_v58, %v1497_v60  ;;  %v1503_v23 = vsel %vm625_vm3, %v1485_v57, %v1487_v48 }
 0x7e0   : > { %1537 = vmatprep.subr.bf16.mxu0 %v1507_v61 }
 0x7e1   : > { %1538 = vmatpush1.bf16.msra.mxu0 %v1506_v63 }
 0x7e2   : > { %v1499_v3 = vpop.permute.xlu1 %1498  ;;  %v1479_v6 = vpop.permute.xlu0 %1478 }
 0x7e3   : > { %v1508_v0 = vsel %vm625_vm3, %v1497_v60, %v1499_v3 }
 0x7e4   : > { %2974 = vmatpush3.bf16.msra.mxu1 %v1508_v0 }
 0x7e5   : > { %2975 = vmatprep.subr.bf16.mxu1 %v3324_v37 }
 0x7e6   : > { %v1489_v7 = vpop.permute.xlu1 %1488  ;;  %v1477_v24 = vpop.permute.xlu0 %1476 }
 0x7e7   : > { %v1505_v8 = vsel %vm625_vm3, %v1489_v7, %v1491_v59  ;;  %v1504_v10 = vsel %vm625_vm3, %v1487_v48, %v1489_v7  ;;  %v1500_v27 = vsel %vm625_vm3, %v1477_v24, %v1479_v6 }
 0x7e8   : > { %1539 = vmatprep.subr.bf16.mxu0 %v1504_v10  ;;  %2976 = vmatpush3.bf16.msra.mxu1 %v1505_v8 }
 0x7e9   : > { %1540 = vmatpush1.bf16.msra.mxu0 %v1503_v23  ;;  %2977 = vmatprep.subr.bf16.mxu1 %v3324_v37 }
 0x7ea   : > { %v1481_v25 = vpop.permute.xlu1 %1480 }
 0x7eb   : > { %v1501_v26 = vsel %vm625_vm3, %v1479_v6, %v1481_v25 }
 0x7ec   : > { %1541 = vmatprep.subr.bf16.mxu0 %v1501_v26 }
 0x7ed   : > { %1542 = vmatpush1.bf16.msra.mxu0 %v1500_v27 }
 0x7ee   : > { %v1483_v62 = vpop.permute.xlu1 %1482 }
 0x7ef   : > { %v1502_v15 = vsel %vm625_vm3, %v1481_v25, %v1483_v62 }
 0x7f0   : > { %2814 = vmatmul.mubr.msk.bf16.vlgmr.msra.gmra.mxu0 %vm644_vm4, %v3139_v2  ;;  %2978 = vmatpush3.bf16.msra.mxu1 %v1502_v15 }
 0x7f1   : > { %1569 = vmatprep.mubr.bf16.mxu0 %v3320_v1  ;;  %2991 = vmatprep.subr.bf16.mxu1 %v3324_v37 }
 0x7f3   : > { %2980 = vmatmul.mubr.msk.bf16.vlgmr.msra.gmra.mxu1 %vm644_vm4, %v3139_v2  ;;  %v1726_v59 = vpop.permute.xlu0 %1725 }
 0x7f4   : > { %2983 = vmatprep.mubr.msk.bf16.mxu1 %vm3325_vm2, %v3324_v37 }
 0x7f8   : > { %2815 = vmatmul.mubr.msk.bf16.gmra.mxu0 %vm644_vm4, %v3140_v30 }
 0x7f9   : > { %1579 = vmatprep.mubr.bf16.mxu0 %v3320_v1 }
 0x7fb   : > { %2984 = vmatmul.mubr.msk.bf16.gmra.mxu1 %vm644_vm4, %v3140_v30  ;;  %v1731_v58 = vpop.permute.xlu1 %1730 }
 0x7fc   : > { %2987 = vmatprep.mubr.msk.bf16.mxu1 %vm3325_vm2, %v3324_v37 }
 0x800   : > { %2816 = vmatmul.mubr.msk.bf16.gmra.mxu0 %vm644_vm4, %v3141_v31 }
 0x801   : > { %1959 = vmatprep.mubr.bf16.mxu0 %v3320_v1 }
 0x803   : > { %2988 = vmatmul.mubr.msk.bf16.gmra.mxu1 %vm644_vm4, %v3141_v31 }
 0x804   : > { %2997 = vmatprep.mubr.msk.bf16.mxu1 %vm3325_vm2, %v3324_v37 }
 0x8b0   : > { %v1561_v32 = vpop.f32.mrf.mxu0 }
 0x8b2   : > { %v1563_v33 = vpop.f32.mrf.mxu0 }
 0x8b3   : > { %v1624_v35 = vpop.f32.mrf.mxu1  ;;  %1661 = vrot.lane.b32.xlu1 %v1563_v33, %s3326_s28 }
 0x8b4   : > { %1649 = vrot.lane.b32.xlu0 %v1624_v35, %s3326_s28  ;;  %v1565_v39 = vpop.f32.mrf.mxu0 }
 0x8b5   : > { %v2981_v40 = vpop.f32.mrf.mxu1 }
 0x8b6   : > { %v1567_v34 = vpop.f32.mrf.mxu0 }
 0x8b7   : > { %v1627_v41 = vpop.f32.mrf.mxu1 }
 0x8b8   : > { %1659 = vrot.lane.b32.xlu0 %v1561_v32, %s3326_s28  ;;  %1651 = vrot.lane.b32.xlu1 %v1627_v41, %s3326_s28  ;;  %v1571_v42 = vpop.f32.mrf.mxu0 }
 0x8b9   : > { %v2982_v43 = vpop.f32.mrf.mxu1 }
 0x8ba   : > { %v1573_v44 = vpop.f32.mrf.mxu0 }
 0x8bb   : > { %v1632_v45 = vpop.f32.mrf.mxu1 }
 0x8bc   : > { %1663 = vrot.lane.b32.xlu0 %v1565_v39, %s3326_s28  ;;  %1665 = vrot.lane.b32.xlu1 %v1567_v34, %s3326_s28  ;;  %v1575_v46 = vpop.f32.mrf.mxu0 }
 0x8bd   : > { %v2985_v47 = vpop.f32.mrf.mxu1 }
 0x8be   : > { %v1577_v38 = vpop.f32.mrf.mxu0 }
 0x8bf   : > { %v1635_v49 = vpop.f32.mrf.mxu1 }
 0x8c0   : > { %v1581_v50 = vpop.f32.mrf.mxu0 }
 0x8c1   : > { %v2986_v36 = vpop.f32.mrf.mxu1 }
 0x8c2   : > { %v1583_v51 = vpop.f32.mrf.mxu0 }
 0x8c3   : > { %v1640_v52 = vpop.f32.mrf.mxu1  ;;  %1693 = vrot.lane.b32.xlu1 %v1583_v51, %s3327_s23 }
 0x8c4   : > { %1695 = vrot.lane.b32.xlu0 %v1640_v52, %s3327_s23  ;;  %v1585_v54 = vpop.f32.mrf.mxu0 }
 0x8c5   : > { %v2989_v53 = vpop.f32.mrf.mxu1 }
 0x8c6   : > { %v1587_v57 = vpop.f32.mrf.mxu0 }
 0x8c7   : > { %v1643_v55 = vpop.f32.mrf.mxu1  ;;  %1697 = vrot.lane.b32.xlu1 %v1585_v54, %s3327_s23 }
 0x8c8   : > { %1691 = vrot.lane.b32.xlu0 %v1581_v50, %s3327_s23 }
 0x8c9   : > { %v2990_v56 = vpop.f32.mrf.mxu1 }
 0x8cb   : > { %1701 = vrot.lane.b32.xlu1 %v1643_v55, %s3327_s23 }
 0x8cc   : > { %1699 = vrot.lane.b32.xlu0 %v1587_v57, %s3327_s23 }
 0x925   : > { %v1662_v48 = vpop.permute.xlu1 %1661 }
 0x926   : > { %v1650_v60 = vpop.permute.xlu0 %1649 }
 0x927   : > { %v1668_v8 = vsel %vm794_vm5, %v1662_v48, %v1650_v60 }
 0x928   : > { %v1681_v27 = vadd.f32 %v1668_v8, %v1632_v45 }
 0x92a   : > { %v1652_v61 = vpop.permute.xlu1 %1651  ;;  %v1660_v63 = vpop.permute.xlu0 %1659 }
 0x92b   : > { %v1667_v6 = vsel %vm794_vm5, %v1660_v63, %v1662_v48  ;;  %v1677_v24 = vsel %vm794_vm5, %v1650_v60, %v1660_v63 }
 0x92c   : > { %v1680_v10 = vadd.f32 %v1667_v6, %v1573_v44  ;;  %v1679_v62 = vadd.f32 %v1677_v24, %v1571_v42 }
 0x92e   : > { %v1666_v3 = vpop.permute.xlu1 %1665  ;;  %v1664_v0 = vpop.permute.xlu0 %1663 }
 0x92f   : > { %v1670_v15 = vsel %vm794_vm5, %v1666_v3, %v1652_v61  ;;  %v1678_v30 = vsel %vm794_vm5, %v1652_v61, %v1664_v0  ;;  %v1669_v33 = vsel %vm794_vm5, %v1664_v0, %v1666_v3 }
 0x930   : > { %v1684_v41 = vadd.f32 %v1670_v15, %v1635_v49  ;;  %v1682_v43 = vadd.f32 %v1678_v30, %v1575_v46  ;;  %v1683_v47 = vadd.f32 %v1669_v33, %v1577_v38 }
 0x935   : > { %v1694_v7 = vpop.permute.xlu1 %1693 }
 0x936   : > { %v1696_v23 = vpop.permute.xlu0 %1695 }
 0x937   : > { %v1704_v25 = vsel %vm831_vm6, %v1694_v7, %v1696_v23 }
 0x938   : > { %v1718_v26 = vadd.f32 %v1704_v25, %v1680_v10 }
 0x939   : > { %v1698_v2 = vpop.permute.xlu1 %1697 }
 0x93a   : > { %v1734_v31 = vadd.f32 %v1726_v59, %v1718_v26  ;;  %v1692_v32 = vpop.permute.xlu0 %1691  ;;  %v3142_v26 = vld [vmem:[#allocation2 + $0x10] ss:$20 sps:$4 sm:$0xff]  }
 0x93b   : > { %v1703_v35 = vsel %vm831_vm6, %v1692_v32, %v1694_v7  ;;  %v1715_v39 = vsel %vm831_vm6, %v1696_v23, %v1692_v32  ;;  %1856 = vrot.lane.b32.xlu1 %v3142_v26, %s3321_s20  ;;  %v3154_v26 = vld [vmem:[%s4186_s4 + $0x28] sm:$0xff]  }
 0x93c   : > { %v1717_v40 = vadd.f32 %v1703_v35, %v1679_v62  ;;  %v1719_v34 = vadd.f32 %v1715_v39, %v1681_v27  ;;  %v1740_v44 = vmax.f32 %v1734_v31, 0.0 }
 0x93d   : > { %v1702_v45 = vpop.permute.xlu1 %1701 }
 0x93e   : > { %v1733_v42 = vadd.f32 %v1726_v59, %v1717_v40  ;;  %v1735_v50 = vadd.f32 %v1726_v59, %v1719_v34  ;;  %v1716_v36 = vsel %vm831_vm6, %v1702_v45, %v1698_v2  ;;  %v1700_v51 = vpop.permute.xlu0 %1699  ;;  %v1746_v49 = vmul.f32 %v1740_v44, %v3506_v14 }
 0x93f   : > { %v1722_v52 = vadd.f32 %v1716_v36, %v1684_v41  ;;  %v1705_v53 = vsel %vm831_vm6, %v1698_v2, %v1700_v51  ;;  %v1706_v54 = vsel %vm831_vm6, %v1700_v51, %v1702_v45  ;;  %v3148_v45 = vld [vmem:[#allocation2] ss:$20 sps:$4 sm:$0xff]   ;;  %v2831_v51 = vld [vmem:[%s4187_s5 + $0x18] sm:$0xff] }
 0x940   : > { %v1739_v55 = vmax.f32 %v1733_v42, 0.0  ;;  %v1741_v56 = vmax.f32 %v1735_v50, 0.0  ;;  %v1720_v57 = vadd.f32 %v1705_v53, %v1682_v43  ;;  %v1721_v48 = vadd.f32 %v1706_v54, %v1683_v47  ;;  %v2830_v42 = vld [vmem:[%s4187_s5 + $0x10] sm:$0xff] }
 0x941   : > { %v1738_v46 = vadd.f32 %v1731_v58, %v1722_v52 }
 0x942   : > { %v1745_v60 = vmul.f32 %v1739_v55, %v3504_v13  ;;  %v1747_v38 = vmul.f32 %v1741_v56, %v3501_v9  ;;  %v1736_v59 = vadd.f32 %v1731_v58, %v1720_v57  ;;  %v1737_v61 = vadd.f32 %v1731_v58, %v1721_v48 }
 0x943   : > { %v1744_v63 = vmax.f32 %v1738_v46, 0.0 }
 0x944   : > { %v2899_v3 = vpack.c.bf16 %v1746_v49, %v1745_v60  ;;  %v2900_v0 = vpack.c.bf16 %v1747_v38, %v1747_v38  ;;  %v1742_v6 = vmax.f32 %v1736_v59, 0.0  ;;  %v1743_v7 = vmax.f32 %v1737_v61, 0.0 }
 0x945   : > { %v1750_v8 = vmul.f32 %v1744_v63, %v3501_v9 }
 0x946   : > { %1771 = vst [vmem:[#allocation2 + $0x4] sm:$0xff] %v2899_v3  ;;  %1772 = vst [vmem:[#allocation2 + $0xc] sm:$0xf] %v2900_v0  ;;  %v1748_v10 = vmul.f32 %v1742_v6, %v3504_v13  ;;  %v1749_v23 = vmul.f32 %v1743_v7, %v3506_v14 }
 0x947   : > { %v2902_v24 = vpack.c.bf16 %v1750_v8, %v1750_v8 }
 0x948   : > { %v2901_v25 = vpack.c.bf16 %v1749_v23, %v1748_v10  ;;  %v3190_v58 = vpack.c.bf16 %v1749_v23, %v1746_v49  ;;  %v3191_v2 = vpack.c.bf16 %v1748_v10, %v1745_v60  ;;  %v3152_v10 = vld [vmem:[%s4186_s4 + $0x18] sm:$0xff]  }
 0x949   : > { %1774 = vst [vmem:[#allocation2 + $0x20] sm:$0xf] %v2902_v24 }
 0x94a   : > { %1773 = vst [vmem:[#allocation2 + $0x18] sm:$0xff] %v2901_v25  ;;  %1852 = vrot.lane.b32.xlu1 %v3190_v58, %s3321_s20  ;;  %v3153_v25 = vld [vmem:[%s4186_s4 + $0x20] sm:$0xff]  }
 0x94e   : > { %1828 = vrot.lane.b32.xlu1 %v3190_v58, %s3322_s29 }
 0x950   : > { %v3144_v27 = vld [vmem:[#allocation2 + $0xc] ss:$20 sps:$4 sm:$0xff]  }
 0x951   : > { %1854 = vrot.lane.b32.xlu0 %v3144_v27, %s3321_s20  ;;  %v3145_v62 = vld [vmem:[#allocation2 + $0xc] ss:$20 sps:$4 sm:$0xff]   ;;  %v3146_v43 = vld [vmem:[#allocation2 + $0x4] ss:$20 sps:$4 sm:$0xff]   ;;  %v3149_v50 = vld [vmem:[#allocation2 + $0x8] ss:$20 sps:$4 sm:$0xff]  }
 0x952   : > { %v3151_v36 = vld [vmem:[#allocation2 + $0xc] ss:$20 sps:$4 sm:$0xff]  }
 0x955   : > { %1850 = vrot.lane.b32.xlu0 %v3191_v2, %s3321_s20 }
 0x959   : > { %1826 = vrot.lane.b32.xlu0 %v3191_v2, %s3322_s29 }
 0x95d   : > { %1830 = vrot.lane.b32.xlu0 %v3145_v62, %s3322_s29 }
 0x9ad   : > { %v1857_v30 = vpop.permute.xlu1 %1856 }
 0x9bc   : > { %v1853_v32 = vpop.permute.xlu1 %1852 }
 0x9c0   : > { %v1829_v40 = vpop.permute.xlu1 %1828 }
 0x9c3   : > { %v1855_v15 = vpop.permute.xlu0 %1854 }
 0x9c4   : > { %v1860_v34 = vsel %vm582_vm0, %v1855_v15, %v1857_v30  ;;  %v1859_v44 = vsel %vm582_vm0, %v1853_v32, %v1855_v15 }
 0x9c7   : > { %v1851_v31 = vpop.permute.xlu0 %1850 }
 0x9c8   : > { %1892 = vrot.lane.b32.xlu1 %v1851_v31, %s3323_s16  ;;  %v1858_v35 = vsel %vm582_vm0, %v1851_v31, %v1853_v32 }
 0x9cb   : > { %v1827_v33 = vpop.permute.xlu0 %1826 }
 0x9cc   : > { %1884 = vrot.lane.b32.xlu1 %v1827_v33, %s3323_s16  ;;  %v1832_v41 = vsel %vm555_vm1, %v1827_v33, %v1829_v40 }
 0x9cf   : > { %v1831_v39 = vpop.permute.xlu0 %1830 }
 0x9d0   : > { %1894 = vrot.lane.b32.xlu1 %v1858_v35, %s3323_s16  ;;  %1890 = vrot.lane.b32.xlu0 %v1831_v39, %s3323_s16  ;;  %v1833_v47 = vsel %vm555_vm1, %v1829_v40, %v1831_v39 }
 0x9d4   : > { %1886 = vrot.lane.b32.xlu1 %v1832_v41, %s3323_s16  ;;  %1898 = vrot.lane.b32.xlu0 %v1860_v34, %s3323_s16 }
 0x9d8   : > { %1878 = vrot.lane.b32.xlu1 %v3146_v43, %s3323_s16  ;;  %1896 = vrot.lane.b32.xlu0 %v1859_v44, %s3323_s16 }
 0x9dc   : > { %1876 = vrot.lane.b32.xlu1 %v3148_v45, %s3323_s16  ;;  %1888 = vrot.lane.b32.xlu0 %v1833_v47, %s3323_s16 }
 0x9e0   : > { %2125 = vperm.xlu1 %3102, %v2830_v42   ;;  %1880 = vrot.lane.b32.xlu0 %v3149_v50, %s3323_s16 }
 0x9e4   : > { %1882 = vrot.lane.b32.xlu0 %v3151_v36, %s3323_s16 }
 0x9e8   : > { %2130 = vperm.xlu0 %3103, %v2831_v51  }
 0xa3a   : > { %v1893_v52 = vpop.permute.xlu1 %1892 }
 0xa3e   : > { %v1885_v53 = vpop.permute.xlu1 %1884 }
 0xa42   : > { %v1895_v54 = vpop.permute.xlu1 %1894  ;;  %v1891_v55 = vpop.permute.xlu0 %1890 }
 0xa43   : > { %v1906_v38 = vsel %vm625_vm3, %v1893_v52, %v1895_v54 }
 0xa46   : > { %v1887_v56 = vpop.permute.xlu1 %1886  ;;  %v1899_v57 = vpop.permute.xlu0 %1898 }
 0xa47   : > { %v1903_v3 = vsel %vm625_vm3, %v1885_v53, %v1887_v56 }
 0xa4a   : > { %v1897_v48 = vpop.permute.xlu0 %1896  ;;  %v1879_v49 = vpop.permute.xlu1 %1878 }
 0xa4b   : > { %v1908_v46 = vsel %vm625_vm3, %v1897_v48, %v1899_v57  ;;  %v1907_v60 = vsel %vm625_vm3, %v1895_v54, %v1897_v48 }
 0xa4c   : > { %1937 = vmatprep.subr.bf16.mxu0 %v1907_v60  ;;  %2992 = vmatpush3.bf16.msra.mxu1 %v1908_v46 }
 0xa4d   : > { %1938 = vmatpush1.bf16.msra.mxu0 %v1906_v38  ;;  %2993 = vmatprep.subr.bf16.mxu1 %v3324_v37 }
 0xa4e   : > { %v1889_v59 = vpop.permute.xlu0 %1888  ;;  %v1877_v0 = vpop.permute.xlu1 %1876 }
 0xa4f   : > { %v1905_v61 = vsel %vm625_vm3, %v1889_v59, %v1891_v55  ;;  %v1904_v63 = vsel %vm625_vm3, %v1887_v56, %v1889_v59  ;;  %v1900_v8 = vsel %vm625_vm3, %v1877_v0, %v1879_v49 }
 0xa50   : > { %1939 = vmatprep.subr.bf16.mxu0 %v1904_v63  ;;  %2994 = vmatpush3.bf16.msra.mxu1 %v1905_v61 }
 0xa51   : > { %1940 = vmatpush1.bf16.msra.mxu0 %v1903_v3  ;;  %2995 = vmatprep.subr.bf16.mxu1 %v3324_v37 }
 0xa52   : > { %v1881_v6 = vpop.permute.xlu0 %1880 }
 0xa53   : > { %v1901_v7 = vsel %vm625_vm3, %v1879_v49, %v1881_v6 }
 0xa54   : > { %1941 = vmatprep.subr.bf16.mxu0 %v1901_v7 }
 0xa55   : > { %1942 = vmatpush1.bf16.msra.mxu0 %v1900_v8 }
 0xa56   : > { %v1883_v23 = vpop.permute.xlu0 %1882 }
 0xa57   : > { %v1902_v24 = vsel %vm625_vm3, %v1881_v6, %v1883_v23 }
 0xa58   : > { %2846 = vmatmul.mubr.msk.bf16.vlgmr.msra.gmra.mxu0 %vm644_vm4, %v3152_v10  ;;  %2996 = vmatpush3.bf16.msra.mxu1 %v1902_v24 }
 0xa59   : > { %1969 = vmatprep.mubr.bf16.mxu0 %v3320_v1  ;;  %3009 = vmatprep.subr.bf16.mxu1 %v3324_v37 }
 0xa5b   : > { %2998 = vmatmul.mubr.msk.bf16.vlgmr.msra.gmra.mxu1 %vm644_vm4, %v3152_v10  ;;  %v2126_v55 = vpop.permute.xlu1 %2125 }
 0xa5c   : > { %3001 = vmatprep.mubr.msk.bf16.mxu1 %vm3325_vm2, %v3324_v37 }
 0xa60   : > { %2847 = vmatmul.mubr.msk.bf16.gmra.mxu0 %vm644_vm4, %v3153_v25 }
 0xa61   : > { %1979 = vmatprep.mubr.bf16.mxu0 %v3320_v1 }
 0xa63   : > { %3002 = vmatmul.mubr.msk.bf16.gmra.mxu1 %vm644_vm4, %v3153_v25  ;;  %v2131_v54 = vpop.permute.xlu0 %2130 }
 0xa64   : > { %3005 = vmatprep.mubr.msk.bf16.mxu1 %vm3325_vm2, %v3324_v37 }
 0xa68   : > { %2848 = vmatmul.mubr.msk.bf16.gmra.mxu0 %vm644_vm4, %v3154_v26 }
 0xa69   : > { %2433 = vmatprep.mubr.bf16.mxu0 %v3320_v1 }
 0xa6b   : > { %3006 = vmatmul.mubr.msk.bf16.gmra.mxu1 %vm644_vm4, %v3154_v26 }
 0xa6c   : > { %3015 = vmatprep.mubr.msk.bf16.mxu1 %vm3325_vm2, %v3324_v37 }
 0xb18   : > { %v1961_v27 = vpop.f32.mrf.mxu0 }
 0xb1a   : > { %v1963_v58 = vpop.f32.mrf.mxu0 }
 0xb1b   : > { %v2024_v2 = vpop.f32.mrf.mxu1  ;;  %2061 = vrot.lane.b32.xlu0 %v1963_v58, %s3326_s28 }
 0xb1c   : > { %v1965_v62 = vpop.f32.mrf.mxu0  ;;  %2049 = vrot.lane.b32.xlu1 %v2024_v2, %s3326_s28 }
 0xb1d   : > { %v2999_v15 = vpop.f32.mrf.mxu1 }
 0xb1e   : > { %v1967_v30 = vpop.f32.mrf.mxu0 }
 0xb1f   : > { %v2027_v31 = vpop.f32.mrf.mxu1 }
 0xb20   : > { %v1971_v32 = vpop.f32.mrf.mxu0  ;;  %2059 = vrot.lane.b32.xlu1 %v1961_v27, %s3326_s28  ;;  %2051 = vrot.lane.b32.xlu0 %v2027_v31, %s3326_s28 }
 0xb21   : > { %v3000_v33 = vpop.f32.mrf.mxu1 }
 0xb22   : > { %v1973_v35 = vpop.f32.mrf.mxu0 }
 0xb23   : > { %v2032_v39 = vpop.f32.mrf.mxu1 }
 0xb24   : > { %v1975_v40 = vpop.f32.mrf.mxu0  ;;  %2063 = vrot.lane.b32.xlu1 %v1965_v62, %s3326_s28  ;;  %2065 = vrot.lane.b32.xlu0 %v1967_v30, %s3326_s28 }
 0xb25   : > { %v3003_v34 = vpop.f32.mrf.mxu1 }
 0xb26   : > { %v1977_v41 = vpop.f32.mrf.mxu0 }
 0xb27   : > { %v2035_v43 = vpop.f32.mrf.mxu1 }
 0xb28   : > { %v1981_v44 = vpop.f32.mrf.mxu0 }
 0xb29   : > { %v3004_v45 = vpop.f32.mrf.mxu1 }
 0xb2a   : > { %v1983_v47 = vpop.f32.mrf.mxu0 }
 0xb2b   : > { %2093 = vrot.lane.b32.xlu0 %v1983_v47, %s3327_s23  ;;  %v2040_v42 = vpop.f32.mrf.mxu1 }
 0xb2c   : > { %2095 = vrot.lane.b32.xlu1 %v2040_v42, %s3327_s23  ;;  %v1985_v36 = vpop.f32.mrf.mxu0 }
 0xb2d   : > { %v3007_v50 = vpop.f32.mrf.mxu1 }
 0xb2e   : > { %v1987_v53 = vpop.f32.mrf.mxu0 }
 0xb2f   : > { %2097 = vrot.lane.b32.xlu0 %v1985_v36, %s3327_s23  ;;  %v2043_v51 = vpop.f32.mrf.mxu1 }
 0xb30   : > { %2091 = vrot.lane.b32.xlu1 %v1981_v44, %s3327_s23 }
 0xb31   : > { %v3008_v52 = vpop.f32.mrf.mxu1 }
 0xb33   : > { %2101 = vrot.lane.b32.xlu0 %v2043_v51, %s3327_s23 }
 0xb34   : > { %2099 = vrot.lane.b32.xlu1 %v1987_v53, %s3327_s23 }
 0xb8d   : > { %v2062_v56 = vpop.permute.xlu0 %2061 }
 0xb8e   : > { %v2050_v57 = vpop.permute.xlu1 %2049 }
 0xb8f   : > { %v2068_v3 = vsel %vm794_vm5, %v2062_v56, %v2050_v57 }
 0xb90   : > { %v2081_v10 = vadd.f32 %v2068_v3, %v2032_v39 }
 0xb92   : > { %v2052_v48 = vpop.permute.xlu0 %2051  ;;  %v2060_v49 = vpop.permute.xlu1 %2059 }
 0xb93   : > { %v2067_v38 = vsel %vm794_vm5, %v2060_v49, %v2062_v56  ;;  %v2077_v0 = vsel %vm794_vm5, %v2050_v57, %v2060_v49 }
 0xb94   : > { %v2080_v61 = vadd.f32 %v2067_v38, %v1973_v35  ;;  %v2079_v23 = vadd.f32 %v2077_v0, %v1971_v32 }
 0xb96   : > { %v2066_v46 = vpop.permute.xlu0 %2065  ;;  %v2064_v60 = vpop.permute.xlu1 %2063 }
 0xb97   : > { %v2078_v24 = vsel %vm794_vm5, %v2052_v48, %v2064_v60  ;;  %v2070_v25 = vsel %vm794_vm5, %v2066_v46, %v2052_v48  ;;  %v2069_v27 = vsel %vm794_vm5, %v2064_v60, %v2066_v46 }
 0xb98   : > { %v2082_v31 = vadd.f32 %v2078_v24, %v1975_v40  ;;  %v2084_v33 = vadd.f32 %v2070_v25, %v2035_v43  ;;  %v2083_v34 = vadd.f32 %v2069_v27, %v1977_v41 }
 0xb9d   : > { %v2094_v59 = vpop.permute.xlu0 %2093 }
 0xb9e   : > { %v2096_v63 = vpop.permute.xlu1 %2095 }
 0xb9f   : > { %v2104_v6 = vsel %vm831_vm6, %v2094_v59, %v2096_v63 }
 0xba0   : > { %v2118_v7 = vadd.f32 %v2104_v6, %v2080_v61 }
 0xba1   : > { %v2098_v8 = vpop.permute.xlu0 %2097 }
 0xba2   : > { %v2092_v26 = vpop.permute.xlu1 %2091  ;;  %v2134_v62 = vadd.f32 %v2126_v55, %v2118_v7 }
 0xba3   : > { %v2103_v58 = vsel %vm831_vm6, %v2092_v26, %v2094_v59  ;;  %v2115_v2 = vsel %vm831_vm6, %v2096_v63, %v2092_v26  ;;  %v2853_v63 = vld [vmem:[%s4188_s6 + $0x18] sm:$0xff] }
 0xba4   : > { %v2117_v15 = vadd.f32 %v2103_v58, %v2079_v23  ;;  %v2119_v30 = vadd.f32 %v2115_v2, %v2081_v10  ;;  %v3985_v36 = vmul.f32 %v2134_v62, %v3506_v14  ;;  %v2149_v2 = vld [vmem:[#allocation6 + $0x1] sm:$0x1] }
 0xba5   : > { %v2102_v35 = vpop.permute.xlu0 %2101 }
 0xba6   : > { %v2133_v39 = vadd.f32 %v2126_v55, %v2117_v15  ;;  %v2135_v32 = vadd.f32 %v2126_v55, %v2119_v30  ;;  %v2116_v44 = vsel %vm831_vm6, %v2102_v35, %v2098_v8  ;;  %v2100_v45 = vpop.permute.xlu1 %2099 }
 0xba7   : > { %v2122_v47 = vadd.f32 %v2116_v44, %v2084_v33  ;;  %v2105_v42 = vsel %vm831_vm6, %v2098_v8, %v2100_v45  ;;  %v2106_v50 = vsel %vm831_vm6, %v2100_v45, %v2102_v35  ;;  %v2854_v33 = vld [vmem:[%s4190_s8 + $0x10] sm:$0xff]  ;;  %v2857_v45 = vld [vmem:[%s4191_s9 + $0x18] sm:$0xff] }
 0xba8   : > { %v3988_v51 = vmul.f32 %v2133_v39, %v3504_v13  ;;  %v2120_v40 = vadd.f32 %v2105_v42, %v2082_v31  ;;  %v2121_v43 = vadd.f32 %v2106_v50, %v2083_v34  ;;  %v3991_v41 = vmul.f32 %v2135_v32, %v3501_v9  ;;  %v2855_v31 = vld [vmem:[%s4190_s8 + $0x18] sm:$0xff] }
 0xba9   : > { %v2138_v52 = vadd.f32 %v2131_v54, %v2122_v47  ;;  %v2856_v47 = vld [vmem:[%s4191_s9 + $0x10] sm:$0xff] }
 0xbaa   : > { %v2136_v53 = vadd.f32 %v2131_v54, %v2120_v40  ;;  %v2137_v55 = vadd.f32 %v2131_v54, %v2121_v43  ;;  %v2156_v56 = vadd.f32 %v3985_v36, %v3988_v51  ;;  %v2852_v54 = vld [vmem:[%s4188_s6 + $0x10] sm:$0xff] }
 0xbab   : > { %v2144_v46 = vmul.f32 %v2138_v52, %v3501_v9 }
 0xbac   : > { %v2142_v57 = vmul.f32 %v2136_v53, %v3504_v13  ;;  %v2143_v48 = vmul.f32 %v2137_v55, %v3506_v14  ;;  %v2157_v49 = vadd.f32 %v2156_v56, %v3991_v41 }
 0xbae   : > { %2158 = vadd.xlane.f32.xlu1 %v2157_v49  ;;  %v2160_v60 = vadd.f32 %v2143_v48, %v2142_v57 }
 0xbb0   : > { %v2161_v38 = vadd.f32 %v2160_v60, %v2144_v46 }
 0xbb2   : > { %2162 = vadd.xlane.f32.xlu0 %v2161_v38 }
 0xc37   : > { %v2159_v59 = vpop.xlane.xlu1 %2158 }
 0xc38   : > { %v2164_v61 = vmul.f32 0.00390625, %v2159_v59 }
 0xc3a   : > { %v2166_v0 = vmul.f32 %v2852_v54, %v2164_v61 }
 0xc3b   : > { %v2163_v3 = vpop.xlane.xlu0 %2162 }
 0xc3c   : > { %v2165_v6 = vmul.f32 0.00390625, %v2163_v3  ;;  %v2168_v8 = vsel %vm1291_vm7, %v2166_v0, 0.0 }
 0xc3e   : > { %v2167_v7 = vmul.f32 %v2853_v63, %v2165_v6 }
 0xc40   : > { %v2169_v10 = vsel %vm1291_vm7, %v2167_v7, 0.0 }
 0xc41   : > { %v2170_v23 = vadd.f32 %v2169_v10, %v2168_v8 }
 0xc43   : > { %v2171_v24 = vrot.slane %v2170_v23, 4 }
 0xc45   : > { %v2172_v25 = vadd.f32 %v2171_v24, %v2170_v23 }
 0xc47   : > { %v2173_v26 = vrot.slane %v2172_v25, 2 }
 0xc49   : > { %v2174_v27 = vadd.f32 %v2173_v26, %v2172_v25 }
 0xc4b   : > { %v2175_v58 = vrot.slane %v2174_v27, 1 }
 0xc4d   : > { %v2176_v62 = vadd.f32 %v2175_v58, %v2174_v27 }
 0xc4f   : > { %v2177_v15 = vadd.f32 %v2176_v62, %v2149_v2 }
 0xc51   : > { %v2178_v30 = vmax.f32 %v2177_v15, 0.0 }
 0xc53   : > { %v2182_v35 = vrot.slane %v2178_v30, %v3496_v4 }
 0xc55   : > { %v2184_v34 = vmul.f32 %v2855_v31, %v2182_v35  ;;  %v2183_v39 = vmul.f32 %v2854_v33, %v2182_v35 }
 0xc57   : > { %v2188_v32 = vsel %vm1291_vm7, %v2184_v34, 0.0  ;;  %v2185_v44 = vsel %vm1291_vm7, %v2183_v39, 0.0  ;;  %v3161_v34 = vld [vmem:[#allocation2] ss:$20 sps:$4 sm:$0xff]  }
 0xc58   : > { %2189 = vadd.xlane.f32.xlu1 %v2188_v32  ;;  %2186 = vadd.xlane.f32.xlu0 %v2185_v44  ;;  %v2257_v32 = vld [vmem:[%s4193_s11] sm:$0xff] }
 0xce1   : > { %v2190_v42 = vpop.xlane.xlu1 %2189  ;;  %v2187_v50 = vpop.xlane.xlu0 %2186 }
 0xce2   : > { %v2192_v40 = vadd.f32 %v2857_v45, %v2190_v42  ;;  %v2191_v4 = vadd.f32 %v2856_v47, %v2187_v50  ;;  %v2258_v47 = vld [vmem:[%s4193_s11 + $0x8] sm:$0xff] }
 0xce4   : > { %v2859_v43 = vmul.f32 -1.442695, %v2192_v40  ;;  %v2858_v52 = vmul.f32 -1.442695, %v2191_v4 }
 0xce6   : > { %3176 = vpow2.f32 %v2859_v43 }
 0xce7   : > { %3178 = vpow2.f32 %v2858_v52 }
 0xcf3   : > { %v3177_v53 = vpop.eup %3176 }
 0xcf4   : > { %v3179_v55 = vpop.eup %3178  ;;  %v2200_v56 = vadd.f32 1.0, %v3177_v53 }
 0xcf5   : > { %v2199_v49 = vadd.f32 1.0, %v3179_v55 }
 0xcf6   : > { %3180 = vrcp.f32 %v2200_v56 }
 0xcf7   : > { %3182 = vrcp.f32 %v2199_v49 }
 0xd03   : > { %v3181_v60 = vpop.eup %3180 }
 0xd04   : > { %v3183_v38 = vpop.eup %3182  ;;  %2212 = vperm.xlu1 %3102, %v3181_v60  }
 0xd05   : > { %2207 = vperm.xlu0 %3103, %v3183_v38  }
 0xd7f   : > { %v2213_v59 = vpop.permute.xlu1 %2212 }
 0xd80   : > { %v2218_v61 = vmul.f32 %v2213_v59, %v2142_v57  ;;  %v2219_v54 = vmul.f32 %v2213_v59, %v2143_v48  ;;  %v2220_v63 = vmul.f32 %v2213_v59, %v2144_v46  ;;  %v2208_v3 = vpop.permute.xlu0 %2207 }
 0xd81   : > { %v2215_v0 = vmul.f32 %v2208_v3, %v3988_v51  ;;  %v2216_v6 = vmul.f32 %v2208_v3, %v3985_v36  ;;  %v2217_v7 = vmul.f32 %v2208_v3, %v3991_v41 }
 0xd82   : > { %v2224_v8 = vadd.f32 %v2218_v61, %v3769_v22  ;;  %v2225_v10 = vadd.f32 %v2219_v54, %v3772_v28  ;;  %v2226_v23 = vadd.f32 %v2220_v63, %v3775_v29  ;;  %v3155_v28 = vld [vmem:[#allocation2 + $0x10] ss:$20 sps:$4 sm:$0xff]  }
 0xd83   : > { %v2221_v24 = vadd.f32 %v2215_v0, %v3778_v11  ;;  %v2222_v25 = vadd.f32 %v2216_v6, %v3781_v12  ;;  %v2223_v57 = vadd.f32 %v2217_v7, %v3784_v5  ;;  %v3165_v7 = vld [vmem:[%s4192_s10] sm:$0xff]  }
 0xd84   : > { %v2905_v48 = vpack.c.bf16 %v2225_v10, %v2224_v8  ;;  %v2906_v46 = vpack.c.bf16 %v2226_v23, %v2226_v23  ;;  %v3166_v23 = vld [vmem:[%s4192_s10 + $0x8] sm:$0xff]  }
 0xd85   : > { %v2903_v26 = vpack.c.bf16 %v2222_v25, %v2221_v24  ;;  %v2904_v51 = vpack.c.bf16 %v2223_v57, %v2223_v57  ;;  %v3192_v36 = vpack.c.bf16 %v2225_v10, %v2222_v25  ;;  %v3193_v22 = vpack.c.bf16 %v2224_v8, %v2221_v24  ;;  %v3167_v24 = vld [vmem:[%s4192_s10 + $0x10] sm:$0xff]  }
 0xd86   : > { %2249 = vst [vmem:[#allocation2 + $0x18] sm:$0xff] %v2905_v48  ;;  %2250 = vst [vmem:[#allocation2 + $0x20] sm:$0xf] %v2906_v46 }
 0xd87   : > { %2247 = vst [vmem:[#allocation2 + $0x4] sm:$0xff] %v2903_v26  ;;  %2248 = vst [vmem:[#allocation2 + $0xc] sm:$0xf] %v2904_v51  ;;  %2326 = vrot.lane.b32.xlu0 %v3192_v36, %s3321_s20  ;;  %2324 = vrot.lane.b32.xlu1 %v3193_v22, %s3321_s20 }
 0xd8b   : > { %2330 = vrot.lane.b32.xlu0 %v3155_v28, %s3321_s20 }
 0xd8e   : > { %v3157_v29 = vld [vmem:[#allocation2 + $0xc] ss:$20 sps:$4 sm:$0xff]   ;;  %v3159_v33 = vld [vmem:[#allocation2 + $0x4] ss:$20 sps:$4 sm:$0xff]   ;;  %v3162_v44 = vld [vmem:[#allocation2 + $0x8] ss:$20 sps:$4 sm:$0xff]  }
 0xd8f   : > { %2328 = vrot.lane.b32.xlu1 %v3157_v29, %s3321_s20  ;;  %2302 = vrot.lane.b32.xlu0 %v3192_v36, %s3322_s29  ;;  %v3158_v11 = vld [vmem:[#allocation2 + $0xc] ss:$20 sps:$4 sm:$0xff]   ;;  %s3250_s20 = sshll.u32 %s3328_s26, 4  ;;  %s3251_s20 = int_to_ptr.vmem [resolvable:$false] %s3250_s20 }
 0xd90   : > { %v3164_v45 = vld [vmem:[#allocation2 + $0xc] ss:$20 sps:$4 sm:$0xff]  }
 0xd93   : > { %2300 = vrot.lane.b32.xlu1 %v3193_v22, %s3322_s29 }
 0xd97   : > { %2304 = vrot.lane.b32.xlu1 %v3158_v11, %s3322_s29 }
 0xdf9   : > { %v2325_v12 = vpop.permute.xlu1 %2324  ;;  %v2327_v5 = vpop.permute.xlu0 %2326 }
 0xdfa   : > { %2366 = vrot.lane.b32.xlu0 %v2325_v12, %s3323_s16  ;;  %v2332_v2 = vsel %vm582_vm0, %v2325_v12, %v2327_v5 }
 0xdfd   : > { %v2331_v27 = vpop.permute.xlu0 %2330 }
 0xe01   : > { %v2329_v41 = vpop.permute.xlu1 %2328  ;;  %v2303_v15 = vpop.permute.xlu0 %2302 }
 0xe02   : > { %v2333_v30 = vsel %vm582_vm0, %v2327_v5, %v2329_v41  ;;  %v2334_v35 = vsel %vm582_vm0, %v2329_v41, %v2331_v27 }
 0xe05   : > { %v2301_v58 = vpop.permute.xlu1 %2300 }
 0xe06   : > { %2358 = vrot.lane.b32.xlu0 %v2301_v58, %s3323_s16  ;;  %v2306_v31 = vsel %vm555_vm1, %v2301_v58, %v2303_v15 }
 0xe09   : > { %v2305_v62 = vpop.permute.xlu1 %2304 }
 0xe0a   : > { %2368 = vrot.lane.b32.xlu0 %v2332_v2, %s3323_s16  ;;  %2364 = vrot.lane.b32.xlu1 %v2305_v62, %s3323_s16  ;;  %v2307_v39 = vsel %vm555_vm1, %v2303_v15, %v2305_v62 }
 0xe0e   : > { %2360 = vrot.lane.b32.xlu0 %v2306_v31, %s3323_s16  ;;  %2370 = vrot.lane.b32.xlu1 %v2333_v30, %s3323_s16 }
 0xe12   : > { %2372 = vrot.lane.b32.xlu1 %v2334_v35, %s3323_s16  ;;  %2352 = vrot.lane.b32.xlu0 %v3159_v33, %s3323_s16 }
 0xe16   : > { %2362 = vrot.lane.b32.xlu1 %v2307_v39, %s3323_s16  ;;  %2350 = vrot.lane.b32.xlu0 %v3161_v34, %s3323_s16 }
 0xe1a   : > { %2354 = vrot.lane.b32.xlu1 %v3162_v44, %s3323_s16  ;;  %2599 = vperm.xlu0 %3103, %v2257_v32  }
 0xe1e   : > { %2356 = vrot.lane.b32.xlu1 %v3164_v45, %s3323_s16 }
 0xe22   : > { %2604 = vperm.xlu1 %3102, %v2258_v47  }
 0xe6c   : > { %v2367_v42 = vpop.permute.xlu0 %2366 }
 0xe78   : > { %v2359_v50 = vpop.permute.xlu0 %2358 }
 0xe7c   : > { %v2369_v40 = vpop.permute.xlu0 %2368  ;;  %v2365_v4 = vpop.permute.xlu1 %2364 }
 0xe7d   : > { %v2380_v55 = vsel %vm625_vm3, %v2367_v42, %v2369_v40 }
 0xe80   : > { %v2361_v43 = vpop.permute.xlu0 %2360  ;;  %v2371_v52 = vpop.permute.xlu1 %2370 }
 0xe81   : > { %v2381_v53 = vsel %vm625_vm3, %v2369_v40, %v2371_v52  ;;  %v2377_v54 = vsel %vm625_vm3, %v2359_v50, %v2361_v43 }
 0xe82   : > { %2411 = vmatprep.subr.bf16.mxu0 %v2381_v53 }
 0xe83   : > { %2412 = vmatpush1.bf16.msra.mxu0 %v2380_v55 }
 0xe84   : > { %v2373_v56 = vpop.permute.xlu1 %2372  ;;  %v2353_v60 = vpop.permute.xlu0 %2352 }
 0xe85   : > { %v2382_v49 = vsel %vm625_vm3, %v2371_v52, %v2373_v56 }
 0xe86   : > { %3010 = vmatpush3.bf16.msra.mxu1 %v2382_v49 }
 0xe87   : > { %3011 = vmatprep.subr.bf16.mxu1 %v3324_v37 }
 0xe88   : > { %v2363_v38 = vpop.permute.xlu1 %2362  ;;  %v2351_v63 = vpop.permute.xlu0 %2350 }
 0xe89   : > { %v2379_v59 = vsel %vm625_vm3, %v2363_v38, %v2365_v4  ;;  %v2378_v61 = vsel %vm625_vm3, %v2361_v43, %v2363_v38  ;;  %v2374_v6 = vsel %vm625_vm3, %v2351_v63, %v2353_v60 }
 0xe8a   : > { %2413 = vmatprep.subr.bf16.mxu0 %v2378_v61  ;;  %3012 = vmatpush3.bf16.msra.mxu1 %v2379_v59 }
 0xe8b   : > { %2414 = vmatpush1.bf16.msra.mxu0 %v2377_v54  ;;  %3013 = vmatprep.subr.bf16.mxu1 %v3324_v37 }
 0xe8c   : > { %v2355_v3 = vpop.permute.xlu1 %2354 }
 0xe8d   : > { %v2375_v0 = vsel %vm625_vm3, %v2353_v60, %v2355_v3 }
 0xe8e   : > { %2415 = vmatprep.subr.bf16.mxu0 %v2375_v0 }
 0xe8f   : > { %2416 = vmatpush1.bf16.msra.mxu0 %v2374_v6 }
 0xe90   : > { %v2357_v8 = vpop.permute.xlu1 %2356 }
 0xe91   : > { %v2376_v10 = vsel %vm625_vm3, %v2355_v3, %v2357_v8 }
 0xe92   : > { %2878 = vmatmul.mubr.msk.bf16.vlgmr.msra.gmra.mxu0 %vm644_vm4, %v3165_v7  ;;  %3014 = vmatpush3.bf16.msra.mxu1 %v2376_v10 }
 0xe93   : > { %2443 = vmatprep.mubr.bf16.mxu0 %v3320_v1 }
 0xe95   : > { %3016 = vmatmul.mubr.msk.bf16.vlgmr.msra.gmra.mxu1 %vm644_vm4, %v3165_v7  ;;  %v2600_v34 = vpop.permute.xlu0 %2599 }
 0xe96   : > { %3019 = vmatprep.mubr.msk.bf16.mxu1 %vm3325_vm2, %v3324_v37 }
 0xe9a   : > { %2879 = vmatmul.mubr.msk.bf16.gmra.mxu0 %vm644_vm4, %v3166_v23 }
 0xe9b   : > { %2453 = vmatprep.mubr.bf16.mxu0 %v3320_v1 }
 0xe9d   : > { %3020 = vmatmul.mubr.msk.bf16.gmra.mxu1 %vm644_vm4, %v3166_v23  ;;  %v2605_v35 = vpop.permute.xlu1 %2604 }
 0xe9e   : > { %3023 = vmatprep.mubr.msk.bf16.mxu1 %vm3325_vm2, %v3324_v37 }
 0xea2   : > { %2880 = vmatmul.mubr.msk.bf16.gmra.mxu0 %vm644_vm4, %v3167_v24 }
 0xea5   : > { %3024 = vmatmul.mubr.msk.bf16.gmra.mxu1 %vm644_vm4, %v3167_v24 }
 0xf52   : > { %v2435_v25 = vpop.f32.mrf.mxu0 }
 0xf54   : > { %v2437_v57 = vpop.f32.mrf.mxu0 }
 0xf55   : > { %v2498_v48 = vpop.f32.mrf.mxu1  ;;  %2535 = vrot.lane.b32.xlu1 %v2437_v57, %s3326_s28 }
 0xf56   : > { %2523 = vrot.lane.b32.xlu0 %v2498_v48, %s3326_s28  ;;  %v2439_v1 = vpop.f32.mrf.mxu0 }
 0xf57   : > { %v3017_v46 = vpop.f32.mrf.mxu1 }
 0xf58   : > { %v2441_v26 = vpop.f32.mrf.mxu0 }
 0xf59   : > { %v2501_v51 = vpop.f32.mrf.mxu1 }
 0xf5a   : > { %2533 = vrot.lane.b32.xlu0 %v2435_v25, %s3326_s28  ;;  %2525 = vrot.lane.b32.xlu1 %v2501_v51, %s3326_s28  ;;  %v2445_v37 = vpop.f32.mrf.mxu0 }
 0xf5b   : > { %v3018_v36 = vpop.f32.mrf.mxu1 }
 0xf5c   : > { %v2447_v22 = vpop.f32.mrf.mxu0 }
 0xf5d   : > { %v2506_v28 = vpop.f32.mrf.mxu1 }
 0xf5e   : > { %2537 = vrot.lane.b32.xlu0 %v2439_v1, %s3326_s28  ;;  %2539 = vrot.lane.b32.xlu1 %v2441_v26, %s3326_s28  ;;  %v2449_v29 = vpop.f32.mrf.mxu0  ;;  %s432_s28 = sand.u32 1, %s3306_s22  }
 0xf5f   : > { %v3021_v11 = vpop.f32.mrf.mxu1  ;;  %s4142_s19 = scalar_lea.sflag [#allocation5], %s432_s28 }
 0xf60   : > { %v2451_v12 = vpop.f32.mrf.mxu0 }
 0xf61   : > { %v2509_v5 = vpop.f32.mrf.mxu1 }
 0xf62   : > { %v2455_v41 = vpop.f32.mrf.mxu0 }
 0xf63   : > { %v3022_v27 = vpop.f32.mrf.mxu1 }
 0xf64   : > { %v2457_v58 = vpop.f32.mrf.mxu0 }
 0xf65   : > { %v2514_v2 = vpop.f32.mrf.mxu1  ;;  %2567 = vrot.lane.b32.xlu1 %v2457_v58, %s3327_s23 }
 0xf66   : > { %2569 = vrot.lane.b32.xlu0 %v2514_v2, %s3327_s23  ;;  %v2459_v15 = vpop.f32.mrf.mxu0 }
 0xf67   : > { %v3025_v62 = vpop.f32.mrf.mxu1 }
 0xf68   : > { %v2461_v33 = vpop.f32.mrf.mxu0 }
 0xf69   : > { %2571 = vrot.lane.b32.xlu1 %v2459_v15, %s3327_s23  ;;  %v2517_v30 = vpop.f32.mrf.mxu1 }
 0xf6a   : > { %2565 = vrot.lane.b32.xlu0 %v2455_v41, %s3327_s23 }
 0xf6b   : > { %v3026_v31 = vpop.f32.mrf.mxu1 }
 0xf6d   : > { %2575 = vrot.lane.b32.xlu1 %v2517_v30, %s3327_s23 }
 0xf6e   : > { %2573 = vrot.lane.b32.xlu0 %v2461_v33, %s3327_s23  ;;  %s3027_s23 = smul.u32 48, %s432_s28 }
 0xf70   : > { %s434_s29 = scalar_lea.vmem [#allocation8], %s3027_s23  ;;  %s3252_s23 = scalar_lea.vmem %s3251_s20, 1536 }
 0xf71   : > { %s2645_s15 = sshll.u32 %s434_s29, 4  ;;  %s4131_s15 = int_to_ptr.vmem [resolvable:$true] %s2645_s15 }
 0xf72   : > { %s3246_s18 = scalar_lea.vmem %s4131_s15, 768  ;;  %p3253_p8 = scmp.lt.s32.totalorder %s4131_s15, %s3251_s20 }
 0xf73   : > { %p3247_p12 = scmp.ne.s32.totalorder %s4131_s15, %s3246_s18  ;;  %p3254_p11 = scmp.lt.s32.totalorder %s3252_s23, %s3246_s18 }
 0xf75   : > { %p3248_p4 = pnand %p3247_p12, %p4210_p13  ;;  %p3255_p0 = por %p3254_p11, %p3253_p8 }
 0xf77   : > { %p3249_p7 = pneg %p3248_p4 }
 0xf79   : > { %p3256_p1 = pnand %p3255_p0, %p3249_p7 }
 0xfc7   : > { %v2536_v39 = vpop.permute.xlu1 %2535 }
 0xfc8   : > { %v2524_v32 = vpop.permute.xlu0 %2523 }
 0xfc9   : > { %v2542_v4 = vsel %vm794_vm5, %v2536_v39, %v2524_v32 }
 0xfca   : > { %v2555_v49 = vadd.f32 %v2542_v4, %v2506_v28 }
 0xfcc   : > { %v2526_v44 = vpop.permute.xlu1 %2525  ;;  %v2534_v45 = vpop.permute.xlu0 %2533 }
 0xfcd   : > { %v2541_v50 = vsel %vm794_vm5, %v2534_v45, %v2536_v39  ;;  %v2551_v43 = vsel %vm794_vm5, %v2524_v32, %v2534_v45 }
 0xfce   : > { %v2554_v52 = vadd.f32 %v2541_v50, %v2447_v22  ;;  %v2553_v60 = vadd.f32 %v2551_v43, %v2445_v37 }
 0xfd0   : > { %v2540_v47 = vpop.permute.xlu1 %2539  ;;  %v2538_v42 = vpop.permute.xlu0 %2537 }
 0xfd1   : > { %v2544_v59 = vsel %vm794_vm5, %v2540_v47, %v2526_v44  ;;  %v2543_v61 = vsel %vm794_vm5, %v2538_v42, %v2540_v47  ;;  %v2552_v54 = vsel %vm794_vm5, %v2526_v44, %v2538_v42 }
 0xfd2   : > { %v2558_v23 = vadd.f32 %v2544_v59, %v2509_v5  ;;  %v2556_v24 = vadd.f32 %v2552_v54, %v2449_v29  ;;  %v2557_v25 = vadd.f32 %v2543_v61, %v2451_v12 }
 0xfd7   : > { %v2568_v40 = vpop.permute.xlu1 %2567 }
 0xfd8   : > { %v2570_v53 = vpop.permute.xlu0 %2569 }
 0xfd9   : > { %v2578_v55 = vsel %vm831_vm6, %v2568_v40, %v2570_v53 }
 0xfda   : > { %v2592_v56 = vadd.f32 %v2578_v55, %v2554_v52 }
 0xfdb   : > { %v2572_v38 = vpop.permute.xlu1 %2571 }
 0xfdc   : > { %v2608_v63 = vadd.f32 %v2600_v34, %v2592_v56  ;;  %v2566_v3 = vpop.permute.xlu0 %2565 }
 0xfdd   : > { %v2577_v0 = vsel %vm831_vm6, %v2566_v3, %v2568_v40  ;;  %v2589_v6 = vsel %vm831_vm6, %v2570_v53, %v2566_v3 }
 0xfde   : > { %v2614_v7 = vadd.f32 %v2608_v63, %v3518_v19  ;;  %v2591_v8 = vadd.f32 %v2577_v0, %v2553_v60  ;;  %v2593_v10 = vadd.f32 %v2589_v6, %v2555_v49 }
 0xfdf   : > { %v2576_v57 = vpop.permute.xlu1 %2575 }
 0xfe0   : > { %v2620_v48 = vmul.f32 %v2614_v7, %v3506_v14  ;;  %v2607_v1 = vadd.f32 %v2600_v34, %v2591_v8  ;;  %v2609_v46 = vadd.f32 %v2600_v34, %v2593_v10  ;;  %v2590_v26 = vsel %vm831_vm6, %v2576_v57, %v2572_v38  ;;  %v2574_v51 = vpop.permute.xlu0 %2573 }
 0xfe1   : > { %v2596_v37 = vadd.f32 %v2590_v26, %v2558_v23  ;;  %v2579_v36 = vsel %vm831_vm6, %v2572_v38, %v2574_v51  ;;  %v2580_v22 = vsel %vm831_vm6, %v2574_v51, %v2576_v57 }
 0xfe2   : > { %2626 = vst [vmem:[%s434_s29 + $0x8] sm:$0xff] %v2620_v48  ;;  %v2613_v19 = vadd.f32 %v2607_v1, %v3515_v18  ;;  %v2615_v28 = vadd.f32 %v2609_v46, %v3509_v16  ;;  %v2594_v29 = vadd.f32 %v2579_v36, %v2556_v24  ;;  %v2595_v11 = vadd.f32 %v2580_v22, %v2557_v25 }
 0xfe3   : > { %v2612_v12 = vadd.f32 %v2605_v35, %v2596_v37 }
 0xfe4   : > { %v2619_v5 = vmul.f32 %v2613_v19, %v3504_v13  ;;  %v2621_v41 = vmul.f32 %v2615_v28, %v3501_v9  ;;  %v2610_v27 = vadd.f32 %v2605_v35, %v2594_v29  ;;  %v2611_v58 = vadd.f32 %v2605_v35, %v2595_v11 }
 0xfe5   : > { %v2618_v2 = vadd.f32 %v2612_v12, %v3512_v17 }
 0xfe6   : > { %2625 = vst [vmem:[%s434_s29] sm:$0xff] %v2619_v5  ;;  %2627 = vst [vmem:[%s434_s29 + $0x10] sm:$0xff] %v2621_v41  ;;  %v2616_v18 = vadd.f32 %v2610_v27, %v3521_v20  ;;  %v2617_v16 = vadd.f32 %v2611_v58, %v3524_v21 }
 0xfe7   : > { %v2624_v62 = vmul.f32 %v2618_v2, %v3501_v9 }
 0xfe8   : > { %v2622_v15 = vmul.f32 %v2616_v18, %v3504_v13  ;;  %v2623_v30 = vmul.f32 %v2617_v16, %v3506_v14 }
 0xfe9   : > { %2630 = vst [vmem:[%s434_s29 + $0x28] sm:$0xff] %v2624_v62 }
 0xfea   : > { %2628 = vst [vmem:[%s434_s29 + $0x18] sm:$0xff] %v2622_v15  ;;  %2629 = vst [vmem:[%s434_s29 + $0x20] sm:$0xff] %v2623_v30 }
 0xfeb   : > { %3259 = shalt.err (!%p3256_p1)
}
 0xfec   : > { %s3260_s28 = scalar_lea.hbm %s4138_s17, 768  ;;  %s3264_s25 = scalar_lea.hbm %s4194_s12, 1536 }
 0xfed   : > { %p3261_p2 = scmp.ne.s32.totalorder %s4138_s17, %s3260_s28  ;;  %p3265_p5 = scmp.lt.s32.totalorder %s4138_s17, %s4194_s12 }
 0xfee   : > { %p3266_p6 = scmp.lt.s32.totalorder %s3264_s25, %s3260_s28 }
 0xfef   : > { %p3262_p3 = pnand %p3261_p2, %p4210_p13 }
 0xff0   : > { %p3267_p10 = por %p3266_p6, %p3265_p5 }
 0xff1   : > { %p3263_p9 = pneg %p3262_p3 }
 0xff3   : > { %p3268_p12 = pnand %p3267_p10, %p3263_p9 }
 0xff5   : > { %3271 = shalt.err (!%p3268_p12)
}
 0xff6   : > { %s3329_s18 = smov 384   ;;  %s3330_s20 = smov 24  }
 0xff7   : > { %3038 = dma.vmem_to_hbm [thread:$0]  (%p4210_p13), %s4131_s15, 768, %s4138_s17, %s4142_s19, %s3329_s18, %s3329_s18, %s3330_s20  }
 0xff8 PF: > { %p3055_p4 = scmp.ge.s32.totalorder %s3314_s24, 2  ;;  %s2660_s23 = sand.u32 1, %s3302_s21  }
 0xff9   : > { %p4211_p7 = scmp.ne.s32.totalorder %s4202_s14, 0  ;;  %s2661_s28 = scalar_lea.sflag [#allocation5], %s2660_s23 }
 0xffb   : > { %p3048_p8 = pnand %p3055_p4, %p4211_p7 }
 0xffd   : > { %p3049_p11 = pneg %p3048_p8 }
 0xfff   : > { %3297 = dma.done.wait (%p3049_p11), %s2661_s28, 768  }
0x1000   : > { %3299 = vsyncadd (%p3049_p11), %s2661_s28, 4294966528  ;;  %s4212_s29 = sld [smem:[#allocation12_spill]]  ;;  %p24_p0 = scmp.ge.s32.totalorder %s3421_s27, 4  }
0x1001   : > { %s4213_s23 = sld [smem:[#allocation13_spill]]  ;;  %s4214_s21 = smov %s3306_s22 }
0x1002   : > { %s4216_s24 = smov %s3421_s27  ;;  %26 = sbr.rel (!%p24_p0) target bundleno = 5 (0x5), region = 120 }
0x1006   : > { %s4215_s22 = smov %s4212_s29 }
0x1007   :  { %2666 = vsyncpa [#allocation4], 1 }
0x1008   :  { %2668 = vsyncpa [#allocation4 + $0x1], 1 }
0x1009   :  { %2669 = vsyncpa [#allocation7], 1 }
0x100a   :  { %2670 = vsyncpa [#allocation5], 1 }
0x100b   :  { %2672 = vsyncpa [#allocation5 + $0x1], 1 }

</bundles_post_ra>
